<compile_context>
chip_gen: v5e
topology: v5e:2x2
jax: 0.10.0
libtpu: 0.0.40
codegen_flags: <defaults>
</compile_context>

<pallas_src>
import functools

import numpy as np
import jax
import jax.numpy as jnp
from jax import lax
from jax.experimental import pallas as pl
from jax.experimental.pallas import tpu as pltpu

HIDDEN = 8   # torch.nn.RNN(1, 8, 1)
IN_DIM = 1   # input feature size (and Linear(1, 8) input)

# ---- Packed-constant tile: one (8, 128) f32 vreg holding every parameter.
PARAM_ROWS, PARAM_LANES = 8, 128
COL_WHH = 0     # [0:H, 0:H]     W_hh.T
COL_WIH = 8     # [0,   8:16]    W_ih.T   (row vector)
COL_BIAS = 16   # [0,  16:24]    b_ih + b_hh
COL_WLIN = 24   # [0:H, 24]      Linear weight (column)
COL_BLIN = 25   # [0:H, 25]      Linear bias   (column)
COL_LANGS = 32  # [0,  32:32+N]  langs.T

# ---- Merged output tile: rows 0..B-1, lanes [0,T*H) = RNN out, [T*H,T*H+N) = label.
OUT_ROWS, OUT_LANES = 8, 128


def _tree_sum(xs):
    """Pairwise (log-depth) sum: the VPU has no f32 FMA, so a linear accumulate
    chain would be ~2x the depth of serially dependent VALU ops."""
    while len(xs) > 1:
        nxt = [xs[i] + xs[i + 1] for i in range(0, len(xs) - 1, 2)]
        if len(xs) % 2:
            nxt.append(xs[-1])
        xs = nxt
    return xs[0]


def rnn_kernel(x_ref, len_ref, p_ref, out_ref, *, n_langs):
    """
    x_ref  : (B, T)    f32 VMEM   padded inputs (feature dim of 1 squeezed)
    len_ref: (B,)      i32 SMEM   sequence lengths
    p_ref  : (8, 128)  f32 VMEM   packed constants (COL_* layout above)
    out_ref: (8, 128)  f32 VMEM   merged outputs (RNN out + label), zero padded
    """
    B, T = x_ref.shape
    H = HIDDEN
    N = n_langs

    x = x_ref[...]                                      # (B, T)

    # ---- Static views into the single packed-constant tile (one input DMA).
    w_hh_t = p_ref[0:H, COL_WHH:COL_WHH + H]            # (H, H) = W_hh.T
    w_ih = p_ref[0:1, COL_WIH:COL_WIH + H]              # (1, H) = W_ih.T
    bias = p_ref[0:1, COL_BIAS:COL_BIAS + H]            # (1, H) = b_ih + b_hh
    w_lin = p_ref[0:H, COL_WLIN:COL_WLIN + 1]           # (H, 1)
    b_lin = p_ref[0:H, COL_BLIN:COL_BLIN + 1]           # (H, 1)
    langs = p_ref[0:1, COL_LANGS:COL_LANGS + N]         # (1, N) = langs.T

    # ---- Validity predicates from SMEM lengths (no mask DMA), fully hoisted.
    row_ids = lax.broadcasted_iota(jnp.int32, (B, H), 0)
    len_bh = jnp.zeros((B, H), jnp.int32)
    for b in range(B):                                  # B tiny, off the chain
        len_bh = jnp.where(row_ids == b, len_ref[b], len_bh)
    valid = [len_bh > t for t in range(T)]              # list of (B, H) bool

    # ---- Hoisted, recurrence-independent work (off the serial chain):
    # loop-invariant W_hh row broadcasts (broadcast_in_dim is not CSE'd) and the
    # per-step input projections x_t * W_ih + b.
    w_rows = [jnp.broadcast_to(w_hh_t[k:k + 1, :], (B, H)) for k in range(H)]
    pre_in = [x[:, t:t + 1] * w_ih + bias for t in range(T)]      # each (B, H)
    zeros_bh = jnp.zeros((B, H), jnp.float32)

    # ---- Recurrence: h stays in vregs.  Per step: 8 independent broadcast-MACs
    # tree-reduced (depth 3), one tanh (EUP), one select.  T static -> unrolled.
    h = zeros_bh
    outs = []
    for t in range(T):
        if t == 0:
            h_new = jnp.tanh(pre_in[0])                 # h == 0: skip the MACs
        else:
            prods = [h[:, k:k + 1] * w_rows[k] for k in range(H)]
            h_new = jnp.tanh(pre_in[t] + _tree_sum(prods))
        # packed-sequence semantics: hidden freezes after the sequence ends,
        # padded output positions are zero.  One VPU select per target.
        h = jnp.where(valid[t], h_new, h)
        outs.append(jnp.where(valid[t], h_new, zeros_bh))

    # ---- Epilogue on the vreg-resident final h.
    # embed.T = W_lin * langs.T + b_lin (Linear(1,8) on langs is an outer
    # product); label = h @ embed.T as tree-reduced broadcast-MACs.
    embed_t = w_lin * langs + b_lin                     # (H, N)
    lab = _tree_sum([h[:, k:k + 1] * embed_t[k:k + 1, :] for k in range(H)])

    # ---- ONE lane/sublane-dense (8, 128) store; the wrapper slices it apart.
    row_blk = jnp.concatenate(
        outs + [lab, jnp.zeros((B, OUT_LANES - T * H - N), jnp.float32)], axis=1)
    if B < OUT_ROWS:
        row_blk = jnp.concatenate(
            [row_blk, jnp.zeros((OUT_ROWS - B, OUT_LANES), jnp.float32)], axis=0)
    out_ref[...] = row_blk


def pack_constants(params, langs):
    """Build the packed (8, 128) f32 constant tile ONCE (outside the per-call
    path).  Re-run only if the parameters or `langs` change."""
    H = HIDDEN
    N = int(langs.shape[0])
    assert H <= PARAM_ROWS and COL_LANGS + N <= PARAM_LANES
    buf = np.zeros((PARAM_ROWS, PARAM_LANES), np.float32)
    buf[:H, COL_WHH:COL_WHH + H] = np.asarray(params["w_hh"]).T
    buf[0, COL_WIH:COL_WIH + H] = np.asarray(params["w_ih"])[:, 0]
    buf[0, COL_BIAS:COL_BIAS + H] = np.asarray(params["b_ih"]) + np.asarray(params["b_hh"])
    buf[:H, COL_WLIN] = np.asarray(params["w_lin"])[:, 0]
    buf[:H, COL_BLIN] = np.asarray(params["b_lin"])
    buf[0, COL_LANGS:COL_LANGS + N] = np.asarray(langs)[:, 0]
    return jnp.asarray(buf)


def rnn_model_forward(x_pad, lengths, packed_consts, n_langs):
    """x_pad: (B, T, 1) f32, lengths: (B,) int32, packed_consts: (8, 128) f32."""
    B, T, _ = x_pad.shape
    H = HIDDEN
    N = n_langs
    assert B <= OUT_ROWS and T * H + N <= OUT_LANES

    x2d = x_pad[..., 0]                                 # (B, T)
    lens_i32 = lengths.astype(jnp.int32)

    vmem = pl.BlockSpec(memory_space=pltpu.MemorySpace.VMEM)
    smem = pl.BlockSpec(memory_space=pltpu.MemorySpace.SMEM)

    cost = pl.CostEstimate(
        flops=2 * B * T * H * (H + 1) + 2 * B * H * N,
        transcendentals=B * T * H,
        bytes_accessed=4 * (x2d.size + packed_consts.size
                            + OUT_ROWS * OUT_LANES + lens_i32.size),
    )

    out_tile = pl.pallas_call(
        functools.partial(rnn_kernel, n_langs=N),
        out_shape=jax.ShapeDtypeStruct((OUT_ROWS, OUT_LANES), jnp.float32),
        in_specs=[vmem, smem, vmem],
        out_specs=vmem,
        cost_estimate=cost,
    )(x2d, lens_i32, packed_consts)

    out_pad = out_tile[:B, :T * H].reshape(B, T, H)
    label = out_tile[:B, T * H:T * H + N][None, :, :]
    # pad_packed_sequence also returns the lengths (torch int64; int32 here).
    # TODO(synk): torch returns int64 lengths; int32 kept for TPU friendliness.
    return out_pad, lens_i32, label


def reference_forward(x_pad, lengths, langs, params):
    """Pure numpy reference mirroring torch RNN + pad_packed_sequence + matmul."""
    x = np.asarray(x_pad)
    ln = np.asarray(lengths)
    lg = np.asarray(langs)
    w_ih = np.asarray(params["w_ih"])       # (H, 1)
    w_hh = np.asarray(params["w_hh"])       # (H, H)
    b = np.asarray(params["b_ih"]) + np.asarray(params["b_hh"])
    B, T, _ = x.shape
    H = w_hh.shape[0]
    out = np.zeros((B, T, H), np.float32)
    h = np.zeros((B, H), np.float32)
    for t in range(T):
        h_new = np.tanh(x[:, t, :] @ w_ih.T + h @ w_hh.T + b)
        valid = (t < ln)[:, None]
        h = np.where(valid, h_new, h)
        out[:, t, :] = np.where(valid, h_new, 0.0)
    embed = lg @ np.asarray(params["w_lin"]).T + np.asarray(params["b_lin"])  # (N, H)
    label = (h @ embed.T)[None, :, :]
    return out, ln.astype(np.int32), label


def init_params(key):
    kb = 1.0 / np.sqrt(HIDDEN)
    ks = jax.random.split(key, 6)
    u = lambda k, shape: jax.random.uniform(k, shape, jnp.float32, -kb, kb)
    return {
        "w_ih": u(ks[0], (HIDDEN, IN_DIM)),   # RNN weight_ih_l0
        "w_hh": u(ks[1], (HIDDEN, HIDDEN)),   # RNN weight_hh_l0
        "b_ih": u(ks[2], (HIDDEN,)),
        "b_hh": u(ks[3], (HIDDEN,)),
        "w_lin": u(ks[4], (HIDDEN, IN_DIM)),  # Linear(1, 8) weight
        "b_lin": u(ks[5], (HIDDEN,)),
    }


if __name__ == "__main__":
    key = jax.random.PRNGKey(0)
    k_param, k_x, k_langs = jax.random.split(key, 3)

    params = init_params(k_param)

    # Variable-length sequences (what pack_sequence would consume), padded.
    B, T, N = 4, 8, 4
    lengths = jnp.array([8, 6, 5, 3], dtype=jnp.int32)      # sorted descending
    x_pad = jax.random.normal(k_x, (B, T, IN_DIM), jnp.float32)
    # zero out padded positions (pack_sequence never sees them anyway)
    mask = (jnp.arange(T)[None, :] < lengths[:, None])[..., None]
    x_pad = jnp.where(mask, x_pad, 0.0)
    langs = jax.random.normal(k_langs, (N, IN_DIM), jnp.float32)

    # Packed constant tile built ONCE, outside the per-call path.
    packed = pack_constants(params, langs)

    out_pad, out_lens, label = rnn_model_forward(x_pad, lengths, packed, N)
    jax.block_until_ready((out_pad, out_lens, label))

    ref_out, ref_lens, ref_label = reference_forward(x_pad, lengths, langs, params)
    np.testing.assert_allclose(np.asarray(out_pad), ref_out, rtol=1e-5, atol=1e-5)
    np.testing.assert_array_equal(np.asarray(out_lens), ref_lens)
    np.testing.assert_allclose(np.asarray(label), ref_label, rtol=1e-5, atol=1e-5)

    print("KERNEL_OK")
</pallas_src>

<mosaic_0001>
module attributes {stable_mosaic.version = 11 : i64} {
  func.func @rnn_kernel(%arg0: memref<4x8xf32, #tpu.memory_space<vmem>>, %arg1: memref<4xi32, #tpu.memory_space<smem>>, %arg2: memref<8x128xf32, #tpu.memory_space<vmem>>, %arg3: memref<8x128xf32, #tpu.memory_space<vmem>>) attributes {dimension_semantics = [], scalar_prefetch = 0 : i64, scratch_operands = 0 : i64, tpu.core_type = #tpu.core_type<tc>} {
    %c0 = arith.constant 0 : index
    %c0_0 = arith.constant 0 : index
    %0 = vector.load %arg0[%c0, %c0_0] : memref<4x8xf32, #tpu.memory_space<vmem>>, vector<4x8xf32>
    %c0_1 = arith.constant 0 : index
    %c0_2 = arith.constant 0 : index
    %1 = vector.load %arg2[%c0_1, %c0_2] : memref<8x128xf32, #tpu.memory_space<vmem>>, vector<8x8xf32>
    %c0_3 = arith.constant 0 : index
    %c8 = arith.constant 8 : index
    %2 = vector.load %arg2[%c0_3, %c8] : memref<8x128xf32, #tpu.memory_space<vmem>>, vector<1x8xf32>
    %c0_4 = arith.constant 0 : index
    %c16 = arith.constant 16 : index
    %3 = vector.load %arg2[%c0_4, %c16] : memref<8x128xf32, #tpu.memory_space<vmem>>, vector<1x8xf32>
    %c0_5 = arith.constant 0 : index
    %c24 = arith.constant 24 : index
    %4 = vector.load %arg2[%c0_5, %c24] : memref<8x128xf32, #tpu.memory_space<vmem>>, vector<8x1xf32>
    %c0_6 = arith.constant 0 : index
    %c25 = arith.constant 25 : index
    %5 = vector.load %arg2[%c0_6, %c25] : memref<8x128xf32, #tpu.memory_space<vmem>>, vector<8x1xf32>
    %c0_7 = arith.constant 0 : index
    %c32 = arith.constant 32 : index
    %6 = vector.load %arg2[%c0_7, %c32] : memref<8x128xf32, #tpu.memory_space<vmem>>, vector<1x4xf32>
    %7 = tpu.iota {dimensions = array<i32: 0>} : vector<4x8xi32>
    %c0_i32 = arith.constant 0 : i32
    %8 = vector.broadcast %c0_i32 : i32 to vector<4x8xi32>
    %c0_i32_8 = arith.constant 0 : i32
    %9 = vector.broadcast %c0_i32_8 : i32 to vector<4x8xi32>
    %10 = arith.cmpi eq, %7, %9 : vector<4x8xi32>
    %c0_9 = arith.constant 0 : index
    %11 = memref.load %arg1[%c0_9] : memref<4xi32, #tpu.memory_space<smem>>
    %12 = vector.broadcast %11 : i32 to vector<4x8xi32>
    %13 = arith.select %10, %12, %8 : vector<4x8xi1>, vector<4x8xi32>
    %c1_i32 = arith.constant 1 : i32
    %14 = vector.broadcast %c1_i32 : i32 to vector<4x8xi32>
    %15 = arith.cmpi eq, %7, %14 : vector<4x8xi32>
    %c1 = arith.constant 1 : index
    %16 = memref.load %arg1[%c1] : memref<4xi32, #tpu.memory_space<smem>>
    %17 = vector.broadcast %16 : i32 to vector<4x8xi32>
    %18 = arith.select %15, %17, %13 : vector<4x8xi1>, vector<4x8xi32>
    %c2_i32 = arith.constant 2 : i32
    %19 = vector.broadcast %c2_i32 : i32 to vector<4x8xi32>
    %20 = arith.cmpi eq, %7, %19 : vector<4x8xi32>
    %c2 = arith.constant 2 : index
    %21 = memref.load %arg1[%c2] : memref<4xi32, #tpu.memory_space<smem>>
    %22 = vector.broadcast %21 : i32 to vector<4x8xi32>
    %23 = arith.select %20, %22, %18 : vector<4x8xi1>, vector<4x8xi32>
    %c3_i32 = arith.constant 3 : i32
    %24 = vector.broadcast %c3_i32 : i32 to vector<4x8xi32>
    %25 = arith.cmpi eq, %7, %24 : vector<4x8xi32>
    %c3 = arith.constant 3 : index
    %26 = memref.load %arg1[%c3] : memref<4xi32, #tpu.memory_space<smem>>
    %27 = vector.broadcast %26 : i32 to vector<4x8xi32>
    %28 = arith.select %25, %27, %23 : vector<4x8xi1>, vector<4x8xi32>
    %c0_i32_10 = arith.constant 0 : i32
    %29 = vector.broadcast %c0_i32_10 : i32 to vector<4x8xi32>
    %30 = arith.cmpi sgt, %28, %29 : vector<4x8xi32>
    %c1_i32_11 = arith.constant 1 : i32
    %31 = vector.broadcast %c1_i32_11 : i32 to vector<4x8xi32>
    %32 = arith.cmpi sgt, %28, %31 : vector<4x8xi32>
    %c2_i32_12 = arith.constant 2 : i32
    %33 = vector.broadcast %c2_i32_12 : i32 to vector<4x8xi32>
    %34 = arith.cmpi sgt, %28, %33 : vector<4x8xi32>
    %c3_i32_13 = arith.constant 3 : i32
    %35 = vector.broadcast %c3_i32_13 : i32 to vector<4x8xi32>
    %36 = arith.cmpi sgt, %28, %35 : vector<4x8xi32>
    %c4_i32 = arith.constant 4 : i32
    %37 = vector.broadcast %c4_i32 : i32 to vector<4x8xi32>
    %38 = arith.cmpi sgt, %28, %37 : vector<4x8xi32>
    %c5_i32 = arith.constant 5 : i32
    %39 = vector.broadcast %c5_i32 : i32 to vector<4x8xi32>
    %40 = arith.cmpi sgt, %28, %39 : vector<4x8xi32>
    %c6_i32 = arith.constant 6 : i32
    %41 = vector.broadcast %c6_i32 : i32 to vector<4x8xi32>
    %42 = arith.cmpi sgt, %28, %41 : vector<4x8xi32>
    %c7_i32 = arith.constant 7 : i32
    %43 = vector.broadcast %c7_i32 : i32 to vector<4x8xi32>
    %44 = arith.cmpi sgt, %28, %43 : vector<4x8xi32>
    %45 = vector.extract_strided_slice %1 {offsets = [0, 0], sizes = [1, 8], strides = [1, 1]} : vector<8x8xf32> to vector<1x8xf32>
    %46 = vector.shape_cast %45 : vector<1x8xf32> to vector<1x8xf32>
    %47 = vector.broadcast %46 : vector<1x8xf32> to vector<4x8xf32>
    %48 = vector.extract_strided_slice %1 {offsets = [1, 0], sizes = [1, 8], strides = [1, 1]} : vector<8x8xf32> to vector<1x8xf32>
    %49 = vector.shape_cast %48 : vector<1x8xf32> to vector<1x8xf32>
    %50 = vector.broadcast %49 : vector<1x8xf32> to vector<4x8xf32>
    %51 = vector.extract_strided_slice %1 {offsets = [2, 0], sizes = [1, 8], strides = [1, 1]} : vector<8x8xf32> to vector<1x8xf32>
    %52 = vector.shape_cast %51 : vector<1x8xf32> to vector<1x8xf32>
    %53 = vector.broadcast %52 : vector<1x8xf32> to vector<4x8xf32>
    %54 = vector.extract_strided_slice %1 {offsets = [3, 0], sizes = [1, 8], strides = [1, 1]} : vector<8x8xf32> to vector<1x8xf32>
    %55 = vector.shape_cast %54 : vector<1x8xf32> to vector<1x8xf32>
    %56 = vector.broadcast %55 : vector<1x8xf32> to vector<4x8xf32>
    %57 = vector.extract_strided_slice %1 {offsets = [4, 0], sizes = [1, 8], strides = [1, 1]} : vector<8x8xf32> to vector<1x8xf32>
    %58 = vector.shape_cast %57 : vector<1x8xf32> to vector<1x8xf32>
    %59 = vector.broadcast %58 : vector<1x8xf32> to vector<4x8xf32>
    %60 = vector.extract_strided_slice %1 {offsets = [5, 0], sizes = [1, 8], strides = [1, 1]} : vector<8x8xf32> to vector<1x8xf32>
    %61 = vector.shape_cast %60 : vector<1x8xf32> to vector<1x8xf32>
    %62 = vector.broadcast %61 : vector<1x8xf32> to vector<4x8xf32>
    %63 = vector.extract_strided_slice %1 {offsets = [6, 0], sizes = [1, 8], strides = [1, 1]} : vector<8x8xf32> to vector<1x8xf32>
    %64 = vector.shape_cast %63 : vector<1x8xf32> to vector<1x8xf32>
    %65 = vector.broadcast %64 : vector<1x8xf32> to vector<4x8xf32>
    %66 = vector.extract_strided_slice %1 {offsets = [7, 0], sizes = [1, 8], strides = [1, 1]} : vector<8x8xf32> to vector<1x8xf32>
    %67 = vector.shape_cast %66 : vector<1x8xf32> to vector<1x8xf32>
    %68 = vector.broadcast %67 : vector<1x8xf32> to vector<4x8xf32>
    %69 = vector.extract_strided_slice %0 {offsets = [0, 0], sizes = [4, 1], strides = [1, 1]} : vector<4x8xf32> to vector<4x1xf32>
    %70 = vector.broadcast %69 : vector<4x1xf32> to vector<4x8xf32>
    %71 = vector.broadcast %2 : vector<1x8xf32> to vector<4x8xf32>
    %72 = arith.mulf %70, %71 : vector<4x8xf32>
    %73 = vector.broadcast %3 : vector<1x8xf32> to vector<4x8xf32>
    %74 = arith.addf %72, %73 : vector<4x8xf32>
    %75 = vector.extract_strided_slice %0 {offsets = [0, 1], sizes = [4, 1], strides = [1, 1]} : vector<4x8xf32> to vector<4x1xf32>
    %76 = vector.broadcast %75 : vector<4x1xf32> to vector<4x8xf32>
    %77 = vector.broadcast %2 : vector<1x8xf32> to vector<4x8xf32>
    %78 = arith.mulf %76, %77 : vector<4x8xf32>
    %79 = vector.broadcast %3 : vector<1x8xf32> to vector<4x8xf32>
    %80 = arith.addf %78, %79 : vector<4x8xf32>
    %81 = vector.extract_strided_slice %0 {offsets = [0, 2], sizes = [4, 1], strides = [1, 1]} : vector<4x8xf32> to vector<4x1xf32>
    %82 = vector.broadcast %81 : vector<4x1xf32> to vector<4x8xf32>
    %83 = vector.broadcast %2 : vector<1x8xf32> to vector<4x8xf32>
    %84 = arith.mulf %82, %83 : vector<4x8xf32>
    %85 = vector.broadcast %3 : vector<1x8xf32> to vector<4x8xf32>
    %86 = arith.addf %84, %85 : vector<4x8xf32>
    %87 = vector.extract_strided_slice %0 {offsets = [0, 3], sizes = [4, 1], strides = [1, 1]} : vector<4x8xf32> to vector<4x1xf32>
    %88 = vector.broadcast %87 : vector<4x1xf32> to vector<4x8xf32>
    %89 = vector.broadcast %2 : vector<1x8xf32> to vector<4x8xf32>
    %90 = arith.mulf %88, %89 : vector<4x8xf32>
    %91 = vector.broadcast %3 : vector<1x8xf32> to vector<4x8xf32>
    %92 = arith.addf %90, %91 : vector<4x8xf32>
    %93 = vector.extract_strided_slice %0 {offsets = [0, 4], sizes = [4, 1], strides = [1, 1]} : vector<4x8xf32> to vector<4x1xf32>
    %94 = vector.broadcast %93 : vector<4x1xf32> to vector<4x8xf32>
    %95 = vector.broadcast %2 : vector<1x8xf32> to vector<4x8xf32>
    %96 = arith.mulf %94, %95 : vector<4x8xf32>
    %97 = vector.broadcast %3 : vector<1x8xf32> to vector<4x8xf32>
    %98 = arith.addf %96, %97 : vector<4x8xf32>
    %99 = vector.extract_strided_slice %0 {offsets = [0, 5], sizes = [4, 1], strides = [1, 1]} : vector<4x8xf32> to vector<4x1xf32>
    %100 = vector.broadcast %99 : vector<4x1xf32> to vector<4x8xf32>
    %101 = vector.broadcast %2 : vector<1x8xf32> to vector<4x8xf32>
    %102 = arith.mulf %100, %101 : vector<4x8xf32>
    %103 = vector.broadcast %3 : vector<1x8xf32> to vector<4x8xf32>
    %104 = arith.addf %102, %103 : vector<4x8xf32>
    %105 = vector.extract_strided_slice %0 {offsets = [0, 6], sizes = [4, 1], strides = [1, 1]} : vector<4x8xf32> to vector<4x1xf32>
    %106 = vector.broadcast %105 : vector<4x1xf32> to vector<4x8xf32>
    %107 = vector.broadcast %2 : vector<1x8xf32> to vector<4x8xf32>
    %108 = arith.mulf %106, %107 : vector<4x8xf32>
    %109 = vector.broadcast %3 : vector<1x8xf32> to vector<4x8xf32>
    %110 = arith.addf %108, %109 : vector<4x8xf32>
    %111 = vector.extract_strided_slice %0 {offsets = [0, 7], sizes = [4, 1], strides = [1, 1]} : vector<4x8xf32> to vector<4x1xf32>
    %112 = vector.broadcast %111 : vector<4x1xf32> to vector<4x8xf32>
    %113 = vector.broadcast %2 : vector<1x8xf32> to vector<4x8xf32>
    %114 = arith.mulf %112, %113 : vector<4x8xf32>
    %115 = vector.broadcast %3 : vector<1x8xf32> to vector<4x8xf32>
    %116 = arith.addf %114, %115 : vector<4x8xf32>
    %cst = arith.constant 0.000000e+00 : f32
    %117 = vector.broadcast %cst : f32 to vector<4x8xf32>
    %118 = math.tanh %74 : vector<4x8xf32>
    %119 = arith.select %30, %118, %117 : vector<4x8xi1>, vector<4x8xf32>
    %120 = arith.select %30, %118, %117 : vector<4x8xi1>, vector<4x8xf32>
    %121 = vector.extract_strided_slice %119 {offsets = [0, 0], sizes = [4, 1], strides = [1, 1]} : vector<4x8xf32> to vector<4x1xf32>
    %122 = vector.broadcast %121 : vector<4x1xf32> to vector<4x8xf32>
    %123 = arith.mulf %122, %47 : vector<4x8xf32>
    %124 = vector.extract_strided_slice %119 {offsets = [0, 1], sizes = [4, 1], strides = [1, 1]} : vector<4x8xf32> to vector<4x1xf32>
    %125 = vector.broadcast %124 : vector<4x1xf32> to vector<4x8xf32>
    %126 = arith.mulf %125, %50 : vector<4x8xf32>
    %127 = vector.extract_strided_slice %119 {offsets = [0, 2], sizes = [4, 1], strides = [1, 1]} : vector<4x8xf32> to vector<4x1xf32>
    %128 = vector.broadcast %127 : vector<4x1xf32> to vector<4x8xf32>
    %129 = arith.mulf %128, %53 : vector<4x8xf32>
    %130 = vector.extract_strided_slice %119 {offsets = [0, 3], sizes = [4, 1], strides = [1, 1]} : vector<4x8xf32> to vector<4x1xf32>
    %131 = vector.broadcast %130 : vector<4x1xf32> to vector<4x8xf32>
    %132 = arith.mulf %131, %56 : vector<4x8xf32>
    %133 = vector.extract_strided_slice %119 {offsets = [0, 4], sizes = [4, 1], strides = [1, 1]} : vector<4x8xf32> to vector<4x1xf32>
    %134 = vector.broadcast %133 : vector<4x1xf32> to vector<4x8xf32>
    %135 = arith.mulf %134, %59 : vector<4x8xf32>
    %136 = vector.extract_strided_slice %119 {offsets = [0, 5], sizes = [4, 1], strides = [1, 1]} : vector<4x8xf32> to vector<4x1xf32>
    %137 = vector.broadcast %136 : vector<4x1xf32> to vector<4x8xf32>
    %138 = arith.mulf %137, %62 : vector<4x8xf32>
    %139 = vector.extract_strided_slice %119 {offsets = [0, 6], sizes = [4, 1], strides = [1, 1]} : vector<4x8xf32> to vector<4x1xf32>
    %140 = vector.broadcast %139 : vector<4x1xf32> to vector<4x8xf32>
    %141 = arith.mulf %140, %65 : vector<4x8xf32>
    %142 = vector.extract_strided_slice %119 {offsets = [0, 7], sizes = [4, 1], strides = [1, 1]} : vector<4x8xf32> to vector<4x1xf32>
    %143 = vector.broadcast %142 : vector<4x1xf32> to vector<4x8xf32>
    %144 = arith.mulf %143, %68 : vector<4x8xf32>
    %145 = arith.addf %123, %126 : vector<4x8xf32>
    %146 = arith.addf %129, %132 : vector<4x8xf32>
    %147 = arith.addf %135, %138 : vector<4x8xf32>
    %148 = arith.addf %141, %144 : vector<4x8xf32>
    %149 = arith.addf %145, %146 : vector<4x8xf32>
    %150 = arith.addf %147, %148 : vector<4x8xf32>
    %151 = arith.addf %149, %150 : vector<4x8xf32>
    %152 = arith.addf %80, %151 : vector<4x8xf32>
    %153 = math.tanh %152 : vector<4x8xf32>
    %154 = arith.select %32, %153, %119 : vector<4x8xi1>, vector<4x8xf32>
    %155 = arith.select %32, %153, %117 : vector<4x8xi1>, vector<4x8xf32>
    %156 = vector.extract_strided_slice %154 {offsets = [0, 0], sizes = [4, 1], strides = [1, 1]} : vector<4x8xf32> to vector<4x1xf32>
    %157 = vector.broadcast %156 : vector<4x1xf32> to vector<4x8xf32>
    %158 = arith.mulf %157, %47 : vector<4x8xf32>
    %159 = vector.extract_strided_slice %154 {offsets = [0, 1], sizes = [4, 1], strides = [1, 1]} : vector<4x8xf32> to vector<4x1xf32>
    %160 = vector.broadcast %159 : vector<4x1xf32> to vector<4x8xf32>
    %161 = arith.mulf %160, %50 : vector<4x8xf32>
    %162 = vector.extract_strided_slice %154 {offsets = [0, 2], sizes = [4, 1], strides = [1, 1]} : vector<4x8xf32> to vector<4x1xf32>
    %163 = vector.broadcast %162 : vector<4x1xf32> to vector<4x8xf32>
    %164 = arith.mulf %163, %53 : vector<4x8xf32>
    %165 = vector.extract_strided_slice %154 {offsets = [0, 3], sizes = [4, 1], strides = [1, 1]} : vector<4x8xf32> to vector<4x1xf32>
    %166 = vector.broadcast %165 : vector<4x1xf32> to vector<4x8xf32>
    %167 = arith.mulf %166, %56 : vector<4x8xf32>
    %168 = vector.extract_strided_slice %154 {offsets = [0, 4], sizes = [4, 1], strides = [1, 1]} : vector<4x8xf32> to vector<4x1xf32>
    %169 = vector.broadcast %168 : vector<4x1xf32> to vector<4x8xf32>
    %170 = arith.mulf %169, %59 : vector<4x8xf32>
    %171 = vector.extract_strided_slice %154 {offsets = [0, 5], sizes = [4, 1], strides = [1, 1]} : vector<4x8xf32> to vector<4x1xf32>
    %172 = vector.broadcast %171 : vector<4x1xf32> to vector<4x8xf32>
    %173 = arith.mulf %172, %62 : vector<4x8xf32>
    %174 = vector.extract_strided_slice %154 {offsets = [0, 6], sizes = [4, 1], strides = [1, 1]} : vector<4x8xf32> to vector<4x1xf32>
    %175 = vector.broadcast %174 : vector<4x1xf32> to vector<4x8xf32>
    %176 = arith.mulf %175, %65 : vector<4x8xf32>
    %177 = vector.extract_strided_slice %154 {offsets = [0, 7], sizes = [4, 1], strides = [1, 1]} : vector<4x8xf32> to vector<4x1xf32>
    %178 = vector.broadcast %177 : vector<4x1xf32> to vector<4x8xf32>
    %179 = arith.mulf %178, %68 : vector<4x8xf32>
    %180 = arith.addf %158, %161 : vector<4x8xf32>
    %181 = arith.addf %164, %167 : vector<4x8xf32>
    %182 = arith.addf %170, %173 : vector<4x8xf32>
    %183 = arith.addf %176, %179 : vector<4x8xf32>
    %184 = arith.addf %180, %181 : vector<4x8xf32>
    %185 = arith.addf %182, %183 : vector<4x8xf32>
    %186 = arith.addf %184, %185 : vector<4x8xf32>
    %187 = arith.addf %86, %186 : vector<4x8xf32>
    %188 = math.tanh %187 : vector<4x8xf32>
    %189 = arith.select %34, %188, %154 : vector<4x8xi1>, vector<4x8xf32>
    %190 = arith.select %34, %188, %117 : vector<4x8xi1>, vector<4x8xf32>
    %191 = vector.extract_strided_slice %189 {offsets = [0, 0], sizes = [4, 1], strides = [1, 1]} : vector<4x8xf32> to vector<4x1xf32>
    %192 = vector.broadcast %191 : vector<4x1xf32> to vector<4x8xf32>
    %193 = arith.mulf %192, %47 : vector<4x8xf32>
    %194 = vector.extract_strided_slice %189 {offsets = [0, 1], sizes = [4, 1], strides = [1, 1]} : vector<4x8xf32> to vector<4x1xf32>
    %195 = vector.broadcast %194 : vector<4x1xf32> to vector<4x8xf32>
    %196 = arith.mulf %195, %50 : vector<4x8xf32>
    %197 = vector.extract_strided_slice %189 {offsets = [0, 2], sizes = [4, 1], strides = [1, 1]} : vector<4x8xf32> to vector<4x1xf32>
    %198 = vector.broadcast %197 : vector<4x1xf32> to vector<4x8xf32>
    %199 = arith.mulf %198, %53 : vector<4x8xf32>
    %200 = vector.extract_strided_slice %189 {offsets = [0, 3], sizes = [4, 1], strides = [1, 1]} : vector<4x8xf32> to vector<4x1xf32>
    %201 = vector.broadcast %200 : vector<4x1xf32> to vector<4x8xf32>
    %202 = arith.mulf %201, %56 : vector<4x8xf32>
    %203 = vector.extract_strided_slice %189 {offsets = [0, 4], sizes = [4, 1], strides = [1, 1]} : vector<4x8xf32> to vector<4x1xf32>
    %204 = vector.broadcast %203 : vector<4x1xf32> to vector<4x8xf32>
    %205 = arith.mulf %204, %59 : vector<4x8xf32>
    %206 = vector.extract_strided_slice %189 {offsets = [0, 5], sizes = [4, 1], strides = [1, 1]} : vector<4x8xf32> to vector<4x1xf32>
    %207 = vector.broadcast %206 : vector<4x1xf32> to vector<4x8xf32>
    %208 = arith.mulf %207, %62 : vector<4x8xf32>
    %209 = vector.extract_strided_slice %189 {offsets = [0, 6], sizes = [4, 1], strides = [1, 1]} : vector<4x8xf32> to vector<4x1xf32>
    %210 = vector.broadcast %209 : vector<4x1xf32> to vector<4x8xf32>
    %211 = arith.mulf %210, %65 : vector<4x8xf32>
    %212 = vector.extract_strided_slice %189 {offsets = [0, 7], sizes = [4, 1], strides = [1, 1]} : vector<4x8xf32> to vector<4x1xf32>
    %213 = vector.broadcast %212 : vector<4x1xf32> to vector<4x8xf32>
    %214 = arith.mulf %213, %68 : vector<4x8xf32>
    %215 = arith.addf %193, %196 : vector<4x8xf32>
    %216 = arith.addf %199, %202 : vector<4x8xf32>
    %217 = arith.addf %205, %208 : vector<4x8xf32>
    %218 = arith.addf %211, %214 : vector<4x8xf32>
    %219 = arith.addf %215, %216 : vector<4x8xf32>
    %220 = arith.addf %217, %218 : vector<4x8xf32>
    %221 = arith.addf %219, %220 : vector<4x8xf32>
    %222 = arith.addf %92, %221 : vector<4x8xf32>
    %223 = math.tanh %222 : vector<4x8xf32>
    %224 = arith.select %36, %223, %189 : vector<4x8xi1>, vector<4x8xf32>
    %225 = arith.select %36, %223, %117 : vector<4x8xi1>, vector<4x8xf32>
    %226 = vector.extract_strided_slice %224 {offsets = [0, 0], sizes = [4, 1], strides = [1, 1]} : vector<4x8xf32> to vector<4x1xf32>
    %227 = vector.broadcast %226 : vector<4x1xf32> to vector<4x8xf32>
    %228 = arith.mulf %227, %47 : vector<4x8xf32>
    %229 = vector.extract_strided_slice %224 {offsets = [0, 1], sizes = [4, 1], strides = [1, 1]} : vector<4x8xf32> to vector<4x1xf32>
    %230 = vector.broadcast %229 : vector<4x1xf32> to vector<4x8xf32>
    %231 = arith.mulf %230, %50 : vector<4x8xf32>
    %232 = vector.extract_strided_slice %224 {offsets = [0, 2], sizes = [4, 1], strides = [1, 1]} : vector<4x8xf32> to vector<4x1xf32>
    %233 = vector.broadcast %232 : vector<4x1xf32> to vector<4x8xf32>
    %234 = arith.mulf %233, %53 : vector<4x8xf32>
    %235 = vector.extract_strided_slice %224 {offsets = [0, 3], sizes = [4, 1], strides = [1, 1]} : vector<4x8xf32> to vector<4x1xf32>
    %236 = vector.broadcast %235 : vector<4x1xf32> to vector<4x8xf32>
    %237 = arith.mulf %236, %56 : vector<4x8xf32>
    %238 = vector.extract_strided_slice %224 {offsets = [0, 4], sizes = [4, 1], strides = [1, 1]} : vector<4x8xf32> to vector<4x1xf32>
    %239 = vector.broadcast %238 : vector<4x1xf32> to vector<4x8xf32>
    %240 = arith.mulf %239, %59 : vector<4x8xf32>
    %241 = vector.extract_strided_slice %224 {offsets = [0, 5], sizes = [4, 1], strides = [1, 1]} : vector<4x8xf32> to vector<4x1xf32>
    %242 = vector.broadcast %241 : vector<4x1xf32> to vector<4x8xf32>
    %243 = arith.mulf %242, %62 : vector<4x8xf32>
    %244 = vector.extract_strided_slice %224 {offsets = [0, 6], sizes = [4, 1], strides = [1, 1]} : vector<4x8xf32> to vector<4x1xf32>
    %245 = vector.broadcast %244 : vector<4x1xf32> to vector<4x8xf32>
    %246 = arith.mulf %245, %65 : vector<4x8xf32>
    %247 = vector.extract_strided_slice %224 {offsets = [0, 7], sizes = [4, 1], strides = [1, 1]} : vector<4x8xf32> to vector<4x1xf32>
    %248 = vector.broadcast %247 : vector<4x1xf32> to vector<4x8xf32>
    %249 = arith.mulf %248, %68 : vector<4x8xf32>
    %250 = arith.addf %228, %231 : vector<4x8xf32>
    %251 = arith.addf %234, %237 : vector<4x8xf32>
    %252 = arith.addf %240, %243 : vector<4x8xf32>
    %253 = arith.addf %246, %249 : vector<4x8xf32>
    %254 = arith.addf %250, %251 : vector<4x8xf32>
    %255 = arith.addf %252, %253 : vector<4x8xf32>
    %256 = arith.addf %254, %255 : vector<4x8xf32>
    %257 = arith.addf %98, %256 : vector<4x8xf32>
    %258 = math.tanh %257 : vector<4x8xf32>
    %259 = arith.select %38, %258, %224 : vector<4x8xi1>, vector<4x8xf32>
    %260 = arith.select %38, %258, %117 : vector<4x8xi1>, vector<4x8xf32>
    %261 = vector.extract_strided_slice %259 {offsets = [0, 0], sizes = [4, 1], strides = [1, 1]} : vector<4x8xf32> to vector<4x1xf32>
    %262 = vector.broadcast %261 : vector<4x1xf32> to vector<4x8xf32>
    %263 = arith.mulf %262, %47 : vector<4x8xf32>
    %264 = vector.extract_strided_slice %259 {offsets = [0, 1], sizes = [4, 1], strides = [1, 1]} : vector<4x8xf32> to vector<4x1xf32>
    %265 = vector.broadcast %264 : vector<4x1xf32> to vector<4x8xf32>
    %266 = arith.mulf %265, %50 : vector<4x8xf32>
    %267 = vector.extract_strided_slice %259 {offsets = [0, 2], sizes = [4, 1], strides = [1, 1]} : vector<4x8xf32> to vector<4x1xf32>
    %268 = vector.broadcast %267 : vector<4x1xf32> to vector<4x8xf32>
    %269 = arith.mulf %268, %53 : vector<4x8xf32>
    %270 = vector.extract_strided_slice %259 {offsets = [0, 3], sizes = [4, 1], strides = [1, 1]} : vector<4x8xf32> to vector<4x1xf32>
    %271 = vector.broadcast %270 : vector<4x1xf32> to vector<4x8xf32>
    %272 = arith.mulf %271, %56 : vector<4x8xf32>
    %273 = vector.extract_strided_slice %259 {offsets = [0, 4], sizes = [4, 1], strides = [1, 1]} : vector<4x8xf32> to vector<4x1xf32>
    %274 = vector.broadcast %273 : vector<4x1xf32> to vector<4x8xf32>
    %275 = arith.mulf %274, %59 : vector<4x8xf32>
    %276 = vector.extract_strided_slice %259 {offsets = [0, 5], sizes = [4, 1], strides = [1, 1]} : vector<4x8xf32> to vector<4x1xf32>
    %277 = vector.broadcast %276 : vector<4x1xf32> to vector<4x8xf32>
    %278 = arith.mulf %277, %62 : vector<4x8xf32>
    %279 = vector.extract_strided_slice %259 {offsets = [0, 6], sizes = [4, 1], strides = [1, 1]} : vector<4x8xf32> to vector<4x1xf32>
    %280 = vector.broadcast %279 : vector<4x1xf32> to vector<4x8xf32>
    %281 = arith.mulf %280, %65 : vector<4x8xf32>
    %282 = vector.extract_strided_slice %259 {offsets = [0, 7], sizes = [4, 1], strides = [1, 1]} : vector<4x8xf32> to vector<4x1xf32>
    %283 = vector.broadcast %282 : vector<4x1xf32> to vector<4x8xf32>
    %284 = arith.mulf %283, %68 : vector<4x8xf32>
    %285 = arith.addf %263, %266 : vector<4x8xf32>
    %286 = arith.addf %269, %272 : vector<4x8xf32>
    %287 = arith.addf %275, %278 : vector<4x8xf32>
    %288 = arith.addf %281, %284 : vector<4x8xf32>
    %289 = arith.addf %285, %286 : vector<4x8xf32>
    %290 = arith.addf %287, %288 : vector<4x8xf32>
    %291 = arith.addf %289, %290 : vector<4x8xf32>
    %292 = arith.addf %104, %291 : vector<4x8xf32>
    %293 = math.tanh %292 : vector<4x8xf32>
    %294 = arith.select %40, %293, %259 : vector<4x8xi1>, vector<4x8xf32>
    %295 = arith.select %40, %293, %117 : vector<4x8xi1>, vector<4x8xf32>
    %296 = vector.extract_strided_slice %294 {offsets = [0, 0], sizes = [4, 1], strides = [1, 1]} : vector<4x8xf32> to vector<4x1xf32>
    %297 = vector.broadcast %296 : vector<4x1xf32> to vector<4x8xf32>
    %298 = arith.mulf %297, %47 : vector<4x8xf32>
    %299 = vector.extract_strided_slice %294 {offsets = [0, 1], sizes = [4, 1], strides = [1, 1]} : vector<4x8xf32> to vector<4x1xf32>
    %300 = vector.broadcast %299 : vector<4x1xf32> to vector<4x8xf32>
    %301 = arith.mulf %300, %50 : vector<4x8xf32>
    %302 = vector.extract_strided_slice %294 {offsets = [0, 2], sizes = [4, 1], strides = [1, 1]} : vector<4x8xf32> to vector<4x1xf32>
    %303 = vector.broadcast %302 : vector<4x1xf32> to vector<4x8xf32>
    %304 = arith.mulf %303, %53 : vector<4x8xf32>
    %305 = vector.extract_strided_slice %294 {offsets = [0, 3], sizes = [4, 1], strides = [1, 1]} : vector<4x8xf32> to vector<4x1xf32>
    %306 = vector.broadcast %305 : vector<4x1xf32> to vector<4x8xf32>
    %307 = arith.mulf %306, %56 : vector<4x8xf32>
    %308 = vector.extract_strided_slice %294 {offsets = [0, 4], sizes = [4, 1], strides = [1, 1]} : vector<4x8xf32> to vector<4x1xf32>
    %309 = vector.broadcast %308 : vector<4x1xf32> to vector<4x8xf32>
    %310 = arith.mulf %309, %59 : vector<4x8xf32>
    %311 = vector.extract_strided_slice %294 {offsets = [0, 5], sizes = [4, 1], strides = [1, 1]} : vector<4x8xf32> to vector<4x1xf32>
    %312 = vector.broadcast %311 : vector<4x1xf32> to vector<4x8xf32>
    %313 = arith.mulf %312, %62 : vector<4x8xf32>
    %314 = vector.extract_strided_slice %294 {offsets = [0, 6], sizes = [4, 1], strides = [1, 1]} : vector<4x8xf32> to vector<4x1xf32>
    %315 = vector.broadcast %314 : vector<4x1xf32> to vector<4x8xf32>
    %316 = arith.mulf %315, %65 : vector<4x8xf32>
    %317 = vector.extract_strided_slice %294 {offsets = [0, 7], sizes = [4, 1], strides = [1, 1]} : vector<4x8xf32> to vector<4x1xf32>
    %318 = vector.broadcast %317 : vector<4x1xf32> to vector<4x8xf32>
    %319 = arith.mulf %318, %68 : vector<4x8xf32>
    %320 = arith.addf %298, %301 : vector<4x8xf32>
    %321 = arith.addf %304, %307 : vector<4x8xf32>
    %322 = arith.addf %310, %313 : vector<4x8xf32>
    %323 = arith.addf %316, %319 : vector<4x8xf32>
    %324 = arith.addf %320, %321 : vector<4x8xf32>
    %325 = arith.addf %322, %323 : vector<4x8xf32>
    %326 = arith.addf %324, %325 : vector<4x8xf32>
    %327 = arith.addf %110, %326 : vector<4x8xf32>
    %328 = math.tanh %327 : vector<4x8xf32>
    %329 = arith.select %42, %328, %294 : vector<4x8xi1>, vector<4x8xf32>
    %330 = arith.select %42, %328, %117 : vector<4x8xi1>, vector<4x8xf32>
    %331 = vector.extract_strided_slice %329 {offsets = [0, 0], sizes = [4, 1], strides = [1, 1]} : vector<4x8xf32> to vector<4x1xf32>
    %332 = vector.broadcast %331 : vector<4x1xf32> to vector<4x8xf32>
    %333 = arith.mulf %332, %47 : vector<4x8xf32>
    %334 = vector.extract_strided_slice %329 {offsets = [0, 1], sizes = [4, 1], strides = [1, 1]} : vector<4x8xf32> to vector<4x1xf32>
    %335 = vector.broadcast %334 : vector<4x1xf32> to vector<4x8xf32>
    %336 = arith.mulf %335, %50 : vector<4x8xf32>
    %337 = vector.extract_strided_slice %329 {offsets = [0, 2], sizes = [4, 1], strides = [1, 1]} : vector<4x8xf32> to vector<4x1xf32>
    %338 = vector.broadcast %337 : vector<4x1xf32> to vector<4x8xf32>
    %339 = arith.mulf %338, %53 : vector<4x8xf32>
    %340 = vector.extract_strided_slice %329 {offsets = [0, 3], sizes = [4, 1], strides = [1, 1]} : vector<4x8xf32> to vector<4x1xf32>
    %341 = vector.broadcast %340 : vector<4x1xf32> to vector<4x8xf32>
    %342 = arith.mulf %341, %56 : vector<4x8xf32>
    %343 = vector.extract_strided_slice %329 {offsets = [0, 4], sizes = [4, 1], strides = [1, 1]} : vector<4x8xf32> to vector<4x1xf32>
    %344 = vector.broadcast %343 : vector<4x1xf32> to vector<4x8xf32>
    %345 = arith.mulf %344, %59 : vector<4x8xf32>
    %346 = vector.extract_strided_slice %329 {offsets = [0, 5], sizes = [4, 1], strides = [1, 1]} : vector<4x8xf32> to vector<4x1xf32>
    %347 = vector.broadcast %346 : vector<4x1xf32> to vector<4x8xf32>
    %348 = arith.mulf %347, %62 : vector<4x8xf32>
    %349 = vector.extract_strided_slice %329 {offsets = [0, 6], sizes = [4, 1], strides = [1, 1]} : vector<4x8xf32> to vector<4x1xf32>
    %350 = vector.broadcast %349 : vector<4x1xf32> to vector<4x8xf32>
    %351 = arith.mulf %350, %65 : vector<4x8xf32>
    %352 = vector.extract_strided_slice %329 {offsets = [0, 7], sizes = [4, 1], strides = [1, 1]} : vector<4x8xf32> to vector<4x1xf32>
    %353 = vector.broadcast %352 : vector<4x1xf32> to vector<4x8xf32>
    %354 = arith.mulf %353, %68 : vector<4x8xf32>
    %355 = arith.addf %333, %336 : vector<4x8xf32>
    %356 = arith.addf %339, %342 : vector<4x8xf32>
    %357 = arith.addf %345, %348 : vector<4x8xf32>
    %358 = arith.addf %351, %354 : vector<4x8xf32>
    %359 = arith.addf %355, %356 : vector<4x8xf32>
    %360 = arith.addf %357, %358 : vector<4x8xf32>
    %361 = arith.addf %359, %360 : vector<4x8xf32>
    %362 = arith.addf %116, %361 : vector<4x8xf32>
    %363 = math.tanh %362 : vector<4x8xf32>
    %364 = arith.select %44, %363, %329 : vector<4x8xi1>, vector<4x8xf32>
    %365 = arith.select %44, %363, %117 : vector<4x8xi1>, vector<4x8xf32>
    %366 = vector.broadcast %4 : vector<8x1xf32> to vector<8x4xf32>
    %367 = vector.broadcast %6 : vector<1x4xf32> to vector<8x4xf32>
    %368 = arith.mulf %366, %367 : vector<8x4xf32>
    %369 = vector.broadcast %5 : vector<8x1xf32> to vector<8x4xf32>
    %370 = arith.addf %368, %369 : vector<8x4xf32>
    %371 = vector.extract_strided_slice %364 {offsets = [0, 0], sizes = [4, 1], strides = [1, 1]} : vector<4x8xf32> to vector<4x1xf32>
    %372 = vector.extract_strided_slice %370 {offsets = [0, 0], sizes = [1, 4], strides = [1, 1]} : vector<8x4xf32> to vector<1x4xf32>
    %373 = vector.broadcast %371 : vector<4x1xf32> to vector<4x4xf32>
    %374 = vector.broadcast %372 : vector<1x4xf32> to vector<4x4xf32>
    %375 = arith.mulf %373, %374 : vector<4x4xf32>
    %376 = vector.extract_strided_slice %364 {offsets = [0, 1], sizes = [4, 1], strides = [1, 1]} : vector<4x8xf32> to vector<4x1xf32>
    %377 = vector.extract_strided_slice %370 {offsets = [1, 0], sizes = [1, 4], strides = [1, 1]} : vector<8x4xf32> to vector<1x4xf32>
    %378 = vector.broadcast %376 : vector<4x1xf32> to vector<4x4xf32>
    %379 = vector.broadcast %377 : vector<1x4xf32> to vector<4x4xf32>
    %380 = arith.mulf %378, %379 : vector<4x4xf32>
    %381 = vector.extract_strided_slice %364 {offsets = [0, 2], sizes = [4, 1], strides = [1, 1]} : vector<4x8xf32> to vector<4x1xf32>
    %382 = vector.extract_strided_slice %370 {offsets = [2, 0], sizes = [1, 4], strides = [1, 1]} : vector<8x4xf32> to vector<1x4xf32>
    %383 = vector.broadcast %381 : vector<4x1xf32> to vector<4x4xf32>
    %384 = vector.broadcast %382 : vector<1x4xf32> to vector<4x4xf32>
    %385 = arith.mulf %383, %384 : vector<4x4xf32>
    %386 = vector.extract_strided_slice %364 {offsets = [0, 3], sizes = [4, 1], strides = [1, 1]} : vector<4x8xf32> to vector<4x1xf32>
    %387 = vector.extract_strided_slice %370 {offsets = [3, 0], sizes = [1, 4], strides = [1, 1]} : vector<8x4xf32> to vector<1x4xf32>
    %388 = vector.broadcast %386 : vector<4x1xf32> to vector<4x4xf32>
    %389 = vector.broadcast %387 : vector<1x4xf32> to vector<4x4xf32>
    %390 = arith.mulf %388, %389 : vector<4x4xf32>
    %391 = vector.extract_strided_slice %364 {offsets = [0, 4], sizes = [4, 1], strides = [1, 1]} : vector<4x8xf32> to vector<4x1xf32>
    %392 = vector.extract_strided_slice %370 {offsets = [4, 0], sizes = [1, 4], strides = [1, 1]} : vector<8x4xf32> to vector<1x4xf32>
    %393 = vector.broadcast %391 : vector<4x1xf32> to vector<4x4xf32>
    %394 = vector.broadcast %392 : vector<1x4xf32> to vector<4x4xf32>
    %395 = arith.mulf %393, %394 : vector<4x4xf32>
    %396 = vector.extract_strided_slice %364 {offsets = [0, 5], sizes = [4, 1], strides = [1, 1]} : vector<4x8xf32> to vector<4x1xf32>
    %397 = vector.extract_strided_slice %370 {offsets = [5, 0], sizes = [1, 4], strides = [1, 1]} : vector<8x4xf32> to vector<1x4xf32>
    %398 = vector.broadcast %396 : vector<4x1xf32> to vector<4x4xf32>
    %399 = vector.broadcast %397 : vector<1x4xf32> to vector<4x4xf32>
    %400 = arith.mulf %398, %399 : vector<4x4xf32>
    %401 = vector.extract_strided_slice %364 {offsets = [0, 6], sizes = [4, 1], strides = [1, 1]} : vector<4x8xf32> to vector<4x1xf32>
    %402 = vector.extract_strided_slice %370 {offsets = [6, 0], sizes = [1, 4], strides = [1, 1]} : vector<8x4xf32> to vector<1x4xf32>
    %403 = vector.broadcast %401 : vector<4x1xf32> to vector<4x4xf32>
    %404 = vector.broadcast %402 : vector<1x4xf32> to vector<4x4xf32>
    %405 = arith.mulf %403, %404 : vector<4x4xf32>
    %406 = vector.extract_strided_slice %364 {offsets = [0, 7], sizes = [4, 1], strides = [1, 1]} : vector<4x8xf32> to vector<4x1xf32>
    %407 = vector.extract_strided_slice %370 {offsets = [7, 0], sizes = [1, 4], strides = [1, 1]} : vector<8x4xf32> to vector<1x4xf32>
    %408 = vector.broadcast %406 : vector<4x1xf32> to vector<4x4xf32>
    %409 = vector.broadcast %407 : vector<1x4xf32> to vector<4x4xf32>
    %410 = arith.mulf %408, %409 : vector<4x4xf32>
    %411 = arith.addf %375, %380 : vector<4x4xf32>
    %412 = arith.addf %385, %390 : vector<4x4xf32>
    %413 = arith.addf %395, %400 : vector<4x4xf32>
    %414 = arith.addf %405, %410 : vector<4x4xf32>
    %415 = arith.addf %411, %412 : vector<4x4xf32>
    %416 = arith.addf %413, %414 : vector<4x4xf32>
    %417 = arith.addf %415, %416 : vector<4x4xf32>
    %cst_14 = arith.constant 0.000000e+00 : f32
    %418 = vector.broadcast %cst_14 : f32 to vector<4x60xf32>
    %419 = tpu.concatenate %120, %155, %190, %225, %260, %295, %330, %365, %417, %418 in 1 : vector<4x8xf32>, vector<4x8xf32>, vector<4x8xf32>, vector<4x8xf32>, vector<4x8xf32>, vector<4x8xf32>, vector<4x8xf32>, vector<4x8xf32>, vector<4x4xf32>, vector<4x60xf32> -> vector<4x128xf32>
    %cst_15 = arith.constant 0.000000e+00 : f32
    %420 = vector.broadcast %cst_15 : f32 to vector<4x128xf32>
    %421 = tpu.concatenate %419, %420 in 0 : vector<4x128xf32>, vector<4x128xf32> -> vector<8x128xf32>
    %c0_16 = arith.constant 0 : index
    %c0_17 = arith.constant 0 : index
    %422 = vector.load %arg3[%c0_16, %c0_17] : memref<8x128xf32, #tpu.memory_space<vmem>>, vector<8x128xf32>
    tpu.vector_store %arg3[%c0_16, %c0_17], %421 {strides = array<i32>} : memref<8x128xf32, #tpu.memory_space<vmem>>, vector<8x128xf32>,
    return
  }
}

</mosaic_0001>

<bundles_post_ra>
// kernel: tpu_custom_call.1
= control target key start
LH: loop header
LB: loop body
LE: loop exit
PB: predicated region body
PF: predicated region fallthrough
CT: control target
= control target key end

     0   :  { %8 = vsyncpa [#allocation3], 0  ;;  %s1193_s0 = inlined_call_operand.hbm [shape: f32[4,8], index: 0, kind: input, shape index: {}]   ;;  %s1194_s1 = inlined_call_operand.hbm [shape: s32[4], index: 1, kind: input, shape index: {}]   ;;  %s1195_s2 = inlined_call_operand.hbm [shape: f32[8,128], index: 2, kind: input, shape index: {}]   ;;  %s1196_s3 = inlined_call_operand.hbm [shape: f32[8,128], index: 3, kind: output, shape index: {}]  }
   0x1   :  { %9 = vsyncpa [#allocation5], 0 }
   0x2   :  { %10 = vsyncpa [#allocation8], 0 }
   0x3   :  { %11 = vsyncpa [#allocation4], 0  ;;  %s17_s14 = sshll.u32 %s1193_s0, 4  ;;  %s895_s15 = smov [#allocation2]   ;;  %s18_s14 = int_to_ptr.hbm [resolvable:$true] %s17_s14 }
   0x4   :  { %s19_s16 = sshll.u32 %s895_s15, 4  ;;  %s28_s19 = sshll.u32 %s1194_s1, 4  ;;  %s20_s16 = int_to_ptr.vmem [resolvable:$true] %s19_s16  ;;  %s29_s19 = int_to_ptr.hbm [resolvable:$true] %s28_s19 }
   0x5   :  { %22 = dma.hbm_to_vmem [thread:$0]  %s18_s14, 64, %s20_s16, [#allocation3]  }
   0x6   :  { %s896_s20 = smov [#allocation6]   ;;  %s37_s23 = sshll.u32 %s1195_s2, 4  ;;  %s38_s23 = int_to_ptr.hbm [resolvable:$true] %s37_s23 }
   0x7   :  { %31 = dma.hbm_to_smem %s29_s19, 16, %s896_s20, [#allocation5]  }
   0x8   :  { %s897_s24 = smov [#allocation7]  }
   0x9   :  { %s39_s25 = sshll.u32 %s897_s24, 4  ;;  %s40_s25 = int_to_ptr.vmem [resolvable:$true] %s39_s25 }
   0xa   :  { %42 = dma.hbm_to_vmem [thread:$0]  %s38_s23, 128, %s40_s25, [#allocation8]  }
   0xb   :  { %887 = dma.done.wait [#allocation3], 64  }
   0xc   :  { %888 = vsyncadd [#allocation3], 4294967232 }
   0xd   :  { %889 = dma.done.wait [#allocation5], 16  }
   0xe   :  { %890 = vsyncadd [#allocation5], 4294967280 }
   0xf   :  { %891 = dma.done.wait [#allocation8], 128  }
  0x10   :  { %892 = vsyncadd [#allocation8], 4294967168 }
  0x11   :  { %55 = sfence }
  0x12   :  { %v953_v0 = vld [vmem:[#allocation2] sm:$0xf]  ;;  %v898_v1 = vmov 0   ;;  %v956_v2 = vld [vmem:[#allocation7] ss:$0 sm:$0xff]  ;;  %s899_s0 = smov 120   ;;  %v59_v6 = vlaneseq }
  0x13   :  { %711 = vset.pattern.permute.xlu0 %v898_v1  ;;  %v900_v3 = vmov 10   ;;  %v901_v4 = vmov 8   ;;  %v902_v5 = vmov 12   ;;  %s62_s1 = sld [smem:[#allocation6]]  ;;  %v903_v22 = vmov 11   ;;  %v989_v33 = vld [vmem:[#allocation7] sm:$0xff] }
  0x14   :  { %95 = vperm.xlu0 %711, %v953_v0   ;;  %714 = vset.pattern.permute.xlu2 %v900_v3  ;;  %s679_s2 = sld [smem:[#allocation6 + $0x1]]  ;;  %v60_v7 = vshrl.u32 %v59_v6, 7  ;;  %v904_v23 = vmov 9   ;;  %v905_v24 = vmov 14   ;;  %v906_v25 = vmov 13   ;;  %s909_s28 = smov 8  }
  0x15   :  { %712 = vset.pattern.permute.xlu1 %v901_v4  ;;  %s680_s26 = sld [smem:[#allocation6 + $0x2]]  ;;  %v907_v26 = vmov 1   ;;  %v908_v27 = vmov 15   ;;  %v992_v34 = vperm.slane %v989_v33, 1  ;;  %v995_v35 = vperm.slane %v989_v33, 3  ;;  %s918_s29 = smov 16  }
  0x16   :  { %vm61_vm0 = vcmp.eq.s32.totalorder %v60_v7, 0  ;;  %s681_s27 = sld [smem:[#allocation6 + $0x3]]  ;;  %vm65_vm1 = vcmp.eq.s32.totalorder %v60_v7, 1  ;;  %vm69_vm2 = vcmp.eq.s32.totalorder %v60_v7, 2  ;;  %vm73_vm3 = vcmp.eq.s32.totalorder %v60_v7, 3  ;;  %s919_s30 = smov 40  }
  0x17   :  { %v998_v36 = vperm.slane %v989_v33, 0  ;;  %v1001_v37 = vperm.slane %v989_v33, 5  ;;  %v1004_v38 = vperm.slane %v989_v33, 2  ;;  %v1007_v39 = vperm.slane %v989_v33, 6  ;;  %s920_s4 = smov 32   ;;  %s921_s5 = smov 24  }
  0x18   :  { %v1010_v40 = vperm.slane %v989_v33, 4  ;;  %v1014_v42 = vperm.slane %v989_v33, 7  ;;  %s922_s6 = smov 48   ;;  %vm639_vm12 = vcmask 64512   ;;  %vm641_vm13 = vcmask 130048   ;;  %s923_s7 = smov [#allocation9]  }
  0x19   :  { %v63_v9 = vstv %s62_s1  ;;  %vm643_vm14 = vcmask 195584   ;;  %vm645_vm15 = vcmask 261120   ;;  %s665_s8 = sshll.u32 %s923_s7, 4  ;;  %s667_s11 = sshll.u32 %s1196_s3, 4  ;;  %s666_s8 = int_to_ptr.vmem [resolvable:$true] %s665_s8  ;;  %s668_s11 = int_to_ptr.hbm [resolvable:$true] %s667_s11 }
  0x1a   :  { %v64_v10 = vsel %vm61_vm0, %v63_v9, 0  ;;  %v67_v11 = vstv %s679_s2  ;;  %v910_v9 = vmov 2   ;;  %vm647_vm0 = vcmask 326656  }
  0x1b   :  { %v68_v12 = vsel %vm65_vm1, %v67_v11, %v64_v10  ;;  %v71_v13 = vstv %s680_s26  ;;  %vm649_vm1 = vcmask 392192  }
  0x1c   :  { %101 = vrot.lane.b32.xlu0 %v956_v2, %s899_s0  ;;  %v72_v17 = vsel %vm69_vm2, %v71_v13, %v68_v12  ;;  %v75_v18 = vstv %s681_s27  ;;  %vm651_vm2 = vcmask 457728  }
  0x1d   :  { %716 = vset.pattern.permute.xlu0 %v902_v5  ;;  %v967_v19 = vsel %vm73_vm3, %v75_v18, %v72_v17  ;;  %vm653_vm3 = vcmask 523264  }
  0x1e   :  { %vm77_vm4 = vcmp.gt.s32.totalorder %v967_v19, 0  ;;  %vm78_vm5 = vcmp.gt.s32.totalorder %v967_v19, 1  ;;  %vm79_vm6 = vcmp.gt.s32.totalorder %v967_v19, 2  ;;  %vm80_vm7 = vcmp.gt.s32.totalorder %v967_v19, 3 }
  0x1f   :  { %vm81_vm8 = vcmp.gt.s32.totalorder %v967_v19, 4  ;;  %vm82_vm9 = vcmp.gt.s32.totalorder %v967_v19, 5  ;;  %vm83_vm10 = vcmp.gt.s32.totalorder %v967_v19, 6  ;;  %vm84_vm11 = vcmp.gt.s32.totalorder %v967_v19, 7 }
  0x86   :  { %v96_v8 = vpop.permute.xlu0 %95 }
  0x87   :  { %v99_v14 = vmul.f32 %v956_v2, %v96_v8 }
  0x8e   :  { %v964_v15 = vpop.permute.xlu0 %101 }
  0x8f   :  { %v104_v16 = vadd.f32 %v964_v15, %v99_v14 }
  0x91   :  { %787 = vtanh.f32 %v104_v16 }
  0x97   :  { %v788_v20 = vpop.eup %787 }
  0x98   :  { %v970_v21 = vsel %vm77_vm4, %v788_v20, 0.0  ;;  %vm655_vm4 = vcmask 556032  }
  0x99   :  { %171 = vperm.xlu0 %716, %v970_v21   ;;  %161 = vperm.xlu2 %714, %v970_v21  }
  0x9a   :  { %151 = vperm.xlu1 %712, %v970_v21  }
  0xa1   :  { %715 = vset.pattern.permute.xlu2 %v903_v22  ;;  %723 = vset.pattern.permute.xlu0 %v900_v3 }
  0xa2   :  { %713 = vset.pattern.permute.xlu1 %v904_v23  ;;  %166 = vperm.xlu2 %715, %v970_v21  }
  0xa3   :  { %156 = vperm.xlu1 %713, %v970_v21  }
  0xaa   :  { %718 = vset.pattern.permute.xlu2 %v905_v24 }
  0xab   :  { %717 = vset.pattern.permute.xlu1 %v906_v25  ;;  %181 = vperm.xlu2 %718, %v970_v21  }
  0xac   :  { %176 = vperm.xlu1 %717, %v970_v21  }
  0xb3   :  { %720 = vset.pattern.permute.xlu2 %v907_v26 }
  0xb4   :  { %719 = vset.pattern.permute.xlu1 %v908_v27  ;;  %106 = vperm.xlu2 %720, %v953_v0  }
  0xb5   :  { %186 = vperm.xlu1 %719, %v970_v21  }
  0xbc   :  { %722 = vset.pattern.permute.xlu2 %v904_v23 }
  0xbd   :  { %721 = vset.pattern.permute.xlu1 %v901_v4 }
  0xf3   :  { %v162_v29 = vpop.permute.xlu2 %161 }
  0xf4   :  { %v164_v48 = vmul.f32 %v162_v29, %v1004_v38 }
  0xfc   :  { %v167_v31 = vpop.permute.xlu2 %166 }
  0xfd   :  { %v169_v45 = vmul.f32 %v167_v31, %v995_v35 }
  0xff   :  { %v191_v54 = vadd.f32 %v169_v45, %v164_v48 }
 0x105   :  { %v182_v43 = vpop.permute.xlu2 %181 }
 0x106   :  { %v184_v50 = vmul.f32 %v182_v43, %v1007_v39 }
 0x10b   :  { %v172_v44 = vpop.permute.xlu0 %171 }
 0x10c   :  { %v152_v28 = vpop.permute.xlu1 %151  ;;  %v174_v51 = vmul.f32 %v172_v44, %v1010_v40 }
 0x10d   :  { %v154_v46 = vmul.f32 %v152_v28, %v998_v36 }
 0x10e   :  { %v107_v60 = vpop.permute.xlu2 %106 }
 0x10f   :  { %v109_v61 = vmul.f32 %v956_v2, %v107_v60 }
 0x111   :  { %v110_v62 = vadd.f32 %v109_v61, %v964_v15 }
 0x115   :  { %v157_v30 = vpop.permute.xlu1 %156 }
 0x116   :  { %v159_v41 = vmul.f32 %v157_v30, %v992_v34 }
 0x118   :  { %v190_v52 = vadd.f32 %v159_v41, %v154_v46 }
 0x11a   :  { %v194_v57 = vadd.f32 %v191_v54, %v190_v52 }
 0x11e   :  { %v177_v32 = vpop.permute.xlu1 %176 }
 0x11f   :  { %v179_v47 = vmul.f32 %v177_v32, %v1001_v37 }
 0x121   :  { %v192_v55 = vadd.f32 %v179_v47, %v174_v51 }
 0x127   :  { %v187_v49 = vpop.permute.xlu1 %186 }
 0x128   :  { %v189_v53 = vmul.f32 %v187_v49, %v1014_v42 }
 0x12a   :  { %v193_v56 = vadd.f32 %v189_v53, %v184_v50 }
 0x12c   :  { %v195_v58 = vadd.f32 %v193_v56, %v192_v55 }
 0x12e   :  { %v196_v59 = vadd.f32 %v195_v58, %v194_v57  ;;  %v911_v58 = vmov 3  }
 0x130   :  { %198 = vrot.lane.b32.xlu0 %v196_v59, %s909_s28 }
 0x1a2   :  { %v199_v63 = vpop.permute.xlu0 %198 }
 0x1a3   :  { %v201_v1 = vadd.f32 %v199_v63, %v110_v62 }
 0x1a5   :  { %789 = vtanh.f32 %v201_v1 }
 0x1ab   :  { %v790_v6 = vpop.eup %789 }
 0x1ac   :  { %v203_v7 = vsel %vm78_vm5, %v790_v6, %v970_v21  ;;  %v1028_v8 = vsel %vm78_vm5, %v790_v6, 0.0  ;;  %vm657_vm5 = vcmask 1043456  }
 0x1ad   :  { %217 = vperm.xlu0 %723, %v203_v7   ;;  %212 = vperm.xlu2 %722, %v203_v7  }
 0x1ae   :  { %207 = vperm.xlu1 %721, %v203_v7  }
 0x1b5   :  { %728 = vset.pattern.permute.xlu0 %v908_v27  ;;  %725 = vset.pattern.permute.xlu2 %v902_v5 }
 0x1b6   :  { %724 = vset.pattern.permute.xlu1 %v903_v22  ;;  %242 = vperm.xlu0 %728, %v203_v7  }
 0x1b7   :  { %227 = vperm.xlu2 %725, %v203_v7   ;;  %222 = vperm.xlu1 %724, %v203_v7  }
 0x1be   :  { %732 = vset.pattern.permute.xlu0 %v900_v3 }
 0x1bf   :  { %727 = vset.pattern.permute.xlu2 %v905_v24  ;;  %726 = vset.pattern.permute.xlu1 %v906_v25 }
 0x1c0   :  { %237 = vperm.xlu2 %727, %v203_v7   ;;  %232 = vperm.xlu1 %726, %v203_v7  }
 0x1c8   :  { %729 = vset.pattern.permute.xlu1 %v910_v9  ;;  %731 = vset.pattern.permute.xlu2 %v904_v23 }
 0x1c9   :  { %112 = vperm.xlu1 %729, %v953_v0  }
 0x1d1   :  { %730 = vset.pattern.permute.xlu1 %v901_v4 }
 0x207   :  { %v213_v10 = vpop.permute.xlu2 %212 }
 0x208   :  { %v215_v29 = vmul.f32 %v213_v10, %v992_v34 }
 0x211   :  { %v228_v13 = vpop.permute.xlu2 %227 }
 0x212   :  { %v230_v31 = vmul.f32 %v228_v13, %v1010_v40 }
 0x21a   :  { %v238_v18 = vpop.permute.xlu2 %237 }
 0x21b   :  { %v240_v32 = vmul.f32 %v238_v18, %v1007_v39 }
 0x21f   :  { %v218_v12 = vpop.permute.xlu0 %217 }
 0x220   :  { %v208_v11 = vpop.permute.xlu1 %207  ;;  %v220_v20 = vmul.f32 %v218_v12, %v1004_v38 }
 0x221   :  { %v210_v26 = vmul.f32 %v208_v11, %v998_v36 }
 0x223   :  { %v246_v44 = vadd.f32 %v215_v29, %v210_v26 }
 0x228   :  { %v243_v16 = vpop.permute.xlu0 %242 }
 0x229   :  { %v223_v14 = vpop.permute.xlu1 %222  ;;  %v245_v28 = vmul.f32 %v243_v16, %v1014_v42 }
 0x22a   :  { %v225_v17 = vmul.f32 %v223_v14, %v995_v35 }
 0x22b   :  { %v249_v45 = vadd.f32 %v245_v28, %v240_v32 }
 0x22c   :  { %v247_v41 = vadd.f32 %v225_v17, %v220_v20 }
 0x22e   :  { %v250_v47 = vadd.f32 %v247_v41, %v246_v44 }
 0x232   :  { %v233_v30 = vpop.permute.xlu1 %232 }
 0x233   :  { %v235_v43 = vmul.f32 %v233_v30, %v1001_v37 }
 0x235   :  { %v248_v46 = vadd.f32 %v235_v43, %v230_v31 }
 0x237   :  { %v251_v48 = vadd.f32 %v249_v45, %v248_v46 }
 0x239   :  { %v252_v49 = vadd.f32 %v251_v48, %v250_v47 }
 0x23b   :  { %254 = vrot.lane.b32.xlu2 %v252_v49, %s909_s28  ;;  %v113_v50 = vpop.permute.xlu1 %112  ;;  %v912_v49 = vmov 4  }
 0x23c   :  { %v115_v51 = vmul.f32 %v956_v2, %v113_v50 }
 0x23e   :  { %v116_v52 = vadd.f32 %v115_v51, %v964_v15 }
 0x295   :  { %v255_v53 = vpop.permute.xlu2 %254 }
 0x296   :  { %v257_v54 = vadd.f32 %v255_v53, %v116_v52 }
 0x298   :  { %791 = vtanh.f32 %v257_v54 }
 0x29e   :  { %v792_v55 = vpop.eup %791 }
 0x29f   :  { %v259_v56 = vsel %vm79_vm6, %v792_v55, %v203_v7  ;;  %v1051_v57 = vsel %vm79_vm6, %v792_v55, 0.0 }
 0x2a0   :  { %273 = vperm.xlu0 %732, %v259_v56   ;;  %268 = vperm.xlu2 %731, %v259_v56  }
 0x2a1   :  { %263 = vperm.xlu1 %730, %v259_v56  }
 0x2a8   :  { %737 = vset.pattern.permute.xlu0 %v908_v27  ;;  %734 = vset.pattern.permute.xlu2 %v902_v5 }
 0x2a9   :  { %733 = vset.pattern.permute.xlu1 %v903_v22  ;;  %298 = vperm.xlu0 %737, %v259_v56  }
 0x2aa   :  { %283 = vperm.xlu2 %734, %v259_v56   ;;  %278 = vperm.xlu1 %733, %v259_v56  }
 0x2b1   :  { %741 = vset.pattern.permute.xlu0 %v900_v3 }
 0x2b2   :  { %736 = vset.pattern.permute.xlu2 %v905_v24  ;;  %735 = vset.pattern.permute.xlu1 %v906_v25 }
 0x2b3   :  { %293 = vperm.xlu2 %736, %v259_v56   ;;  %288 = vperm.xlu1 %735, %v259_v56  }
 0x2bb   :  { %738 = vset.pattern.permute.xlu1 %v911_v58  ;;  %740 = vset.pattern.permute.xlu2 %v904_v23 }
 0x2bc   :  { %118 = vperm.xlu1 %738, %v953_v0  }
 0x2c4   :  { %739 = vset.pattern.permute.xlu1 %v901_v4 }
 0x2fa   :  { %v269_v59 = vpop.permute.xlu2 %268 }
 0x2fb   :  { %v271_v12 = vmul.f32 %v269_v59, %v992_v34 }
 0x304   :  { %v284_v62 = vpop.permute.xlu2 %283 }
 0x305   :  { %v286_v14 = vmul.f32 %v284_v62, %v1010_v40 }
 0x30d   :  { %v294_v7 = vpop.permute.xlu2 %293 }
 0x30e   :  { %v296_v16 = vmul.f32 %v294_v7, %v1007_v39 }
 0x312   :  { %v274_v61 = vpop.permute.xlu0 %273 }
 0x313   :  { %v264_v60 = vpop.permute.xlu1 %263  ;;  %v276_v9 = vmul.f32 %v274_v61, %v1004_v38 }
 0x314   :  { %v266_v10 = vmul.f32 %v264_v60, %v998_v36 }
 0x316   :  { %v302_v20 = vadd.f32 %v271_v12, %v266_v10 }
 0x31b   :  { %v299_v1 = vpop.permute.xlu0 %298 }
 0x31c   :  { %v279_v63 = vpop.permute.xlu1 %278  ;;  %v301_v11 = vmul.f32 %v299_v1, %v1014_v42 }
 0x31d   :  { %v281_v6 = vmul.f32 %v279_v63, %v995_v35 }
 0x31e   :  { %v305_v26 = vadd.f32 %v301_v11, %v296_v16 }
 0x31f   :  { %v303_v17 = vadd.f32 %v281_v6, %v276_v9 }
 0x321   :  { %v306_v29 = vadd.f32 %v303_v17, %v302_v20 }
 0x325   :  { %v289_v13 = vpop.permute.xlu1 %288 }
 0x326   :  { %v291_v18 = vmul.f32 %v289_v13, %v1001_v37 }
 0x328   :  { %v304_v28 = vadd.f32 %v291_v18, %v286_v14 }
 0x32a   :  { %v307_v30 = vadd.f32 %v305_v26, %v304_v28 }
 0x32c   :  { %v308_v31 = vadd.f32 %v307_v30, %v306_v29 }
 0x32e   :  { %310 = vrot.lane.b32.xlu2 %v308_v31, %s909_s28  ;;  %v119_v32 = vpop.permute.xlu1 %118 }
 0x32f   :  { %v121_v41 = vmul.f32 %v956_v2, %v119_v32  ;;  %v913_v32 = vmov 5  }
 0x331   :  { %v122_v43 = vadd.f32 %v121_v41, %v964_v15 }
 0x388   :  { %v311_v44 = vpop.permute.xlu2 %310 }
 0x389   :  { %v313_v45 = vadd.f32 %v311_v44, %v122_v43 }
 0x38b   :  { %793 = vtanh.f32 %v313_v45 }
 0x391   :  { %v794_v46 = vpop.eup %793 }
 0x392   :  { %v315_v47 = vsel %vm80_vm7, %v794_v46, %v259_v56  ;;  %v1074_v48 = vsel %vm80_vm7, %v794_v46, 0.0 }
 0x393   :  { %329 = vperm.xlu0 %741, %v315_v47   ;;  %324 = vperm.xlu2 %740, %v315_v47  }
 0x394   :  { %319 = vperm.xlu1 %739, %v315_v47  }
 0x39b   :  { %746 = vset.pattern.permute.xlu0 %v908_v27  ;;  %743 = vset.pattern.permute.xlu2 %v902_v5 }
 0x39c   :  { %742 = vset.pattern.permute.xlu1 %v903_v22  ;;  %354 = vperm.xlu0 %746, %v315_v47  }
 0x39d   :  { %339 = vperm.xlu2 %743, %v315_v47   ;;  %334 = vperm.xlu1 %742, %v315_v47  }
 0x3a4   :  { %750 = vset.pattern.permute.xlu0 %v900_v3 }
 0x3a5   :  { %745 = vset.pattern.permute.xlu2 %v905_v24  ;;  %744 = vset.pattern.permute.xlu1 %v906_v25 }
 0x3a6   :  { %349 = vperm.xlu2 %745, %v315_v47   ;;  %344 = vperm.xlu1 %744, %v315_v47  }
 0x3ae   :  { %747 = vset.pattern.permute.xlu1 %v912_v49  ;;  %749 = vset.pattern.permute.xlu2 %v904_v23 }
 0x3af   :  { %124 = vperm.xlu1 %747, %v953_v0  }
 0x3b7   :  { %748 = vset.pattern.permute.xlu1 %v901_v4 }
 0x3ed   :  { %v325_v50 = vpop.permute.xlu2 %324 }
 0x3ee   :  { %v327_v62 = vmul.f32 %v325_v50, %v992_v34 }
 0x3f7   :  { %v340_v53 = vpop.permute.xlu2 %339 }
 0x3f8   :  { %v342_v1 = vmul.f32 %v340_v53, %v1010_v40 }
 0x400   :  { %v350_v58 = vpop.permute.xlu2 %349 }
 0x401   :  { %v352_v6 = vmul.f32 %v350_v58, %v1007_v39 }
 0x405   :  { %v330_v52 = vpop.permute.xlu0 %329 }
 0x406   :  { %v320_v51 = vpop.permute.xlu1 %319  ;;  %v332_v59 = vmul.f32 %v330_v52, %v1004_v38 }
 0x407   :  { %v322_v60 = vmul.f32 %v320_v51, %v998_v36 }
 0x409   :  { %v358_v10 = vadd.f32 %v327_v62, %v322_v60 }
 0x40e   :  { %v355_v55 = vpop.permute.xlu0 %354 }
 0x40f   :  { %v335_v54 = vpop.permute.xlu1 %334  ;;  %v357_v61 = vmul.f32 %v355_v55, %v1014_v42 }
 0x410   :  { %v337_v56 = vmul.f32 %v335_v54, %v995_v35 }
 0x411   :  { %v361_v11 = vadd.f32 %v357_v61, %v352_v6 }
 0x412   :  { %v359_v7 = vadd.f32 %v337_v56, %v332_v59 }
 0x414   :  { %v362_v13 = vadd.f32 %v359_v7, %v358_v10 }
 0x418   :  { %v345_v63 = vpop.permute.xlu1 %344 }
 0x419   :  { %v347_v9 = vmul.f32 %v345_v63, %v1001_v37 }
 0x41b   :  { %v360_v12 = vadd.f32 %v347_v9, %v342_v1 }
 0x41d   :  { %v363_v14 = vadd.f32 %v361_v11, %v360_v12 }
 0x41f   :  { %v364_v16 = vadd.f32 %v363_v14, %v362_v13 }
 0x421   :  { %366 = vrot.lane.b32.xlu2 %v364_v16, %s909_s28  ;;  %v125_v17 = vpop.permute.xlu1 %124 }
 0x422   :  { %v127_v18 = vmul.f32 %v956_v2, %v125_v17 }
 0x424   :  { %v128_v20 = vadd.f32 %v127_v18, %v964_v15  ;;  %v914_v18 = vmov 6  }
 0x47b   :  { %v367_v26 = vpop.permute.xlu2 %366 }
 0x47c   :  { %v369_v28 = vadd.f32 %v367_v26, %v128_v20 }
 0x47e   :  { %795 = vtanh.f32 %v369_v28 }
 0x484   :  { %v796_v29 = vpop.eup %795 }
 0x485   :  { %v371_v30 = vsel %vm81_vm8, %v796_v29, %v315_v47  ;;  %v1097_v31 = vsel %vm81_vm8, %v796_v29, 0.0 }
 0x486   :  { %385 = vperm.xlu0 %750, %v371_v30   ;;  %380 = vperm.xlu2 %749, %v371_v30  }
 0x487   :  { %375 = vperm.xlu1 %748, %v371_v30  }
 0x48e   :  { %755 = vset.pattern.permute.xlu0 %v908_v27  ;;  %752 = vset.pattern.permute.xlu2 %v902_v5 }
 0x48f   :  { %751 = vset.pattern.permute.xlu1 %v903_v22  ;;  %410 = vperm.xlu0 %755, %v371_v30  }
 0x490   :  { %395 = vperm.xlu2 %752, %v371_v30   ;;  %390 = vperm.xlu1 %751, %v371_v30  }
 0x497   :  { %759 = vset.pattern.permute.xlu0 %v900_v3 }
 0x498   :  { %754 = vset.pattern.permute.xlu2 %v905_v24  ;;  %753 = vset.pattern.permute.xlu1 %v906_v25 }
 0x499   :  { %405 = vperm.xlu2 %754, %v371_v30   ;;  %400 = vperm.xlu1 %753, %v371_v30  }
 0x4a1   :  { %756 = vset.pattern.permute.xlu1 %v913_v32  ;;  %758 = vset.pattern.permute.xlu2 %v904_v23 }
 0x4a2   :  { %130 = vperm.xlu1 %756, %v953_v0  }
 0x4aa   :  { %757 = vset.pattern.permute.xlu1 %v901_v4 }
 0x4e0   :  { %v381_v41 = vpop.permute.xlu2 %380 }
 0x4e1   :  { %v383_v54 = vmul.f32 %v381_v41, %v992_v34 }
 0x4ea   :  { %v396_v45 = vpop.permute.xlu2 %395 }
 0x4eb   :  { %v398_v56 = vmul.f32 %v396_v45, %v1010_v40 }
 0x4f3   :  { %v406_v50 = vpop.permute.xlu2 %405 }
 0x4f4   :  { %v408_v58 = vmul.f32 %v406_v50, %v1007_v39 }
 0x4f8   :  { %v386_v44 = vpop.permute.xlu0 %385 }
 0x4f9   :  { %v376_v43 = vpop.permute.xlu1 %375  ;;  %v388_v51 = vmul.f32 %v386_v44, %v1004_v38 }
 0x4fa   :  { %v378_v52 = vmul.f32 %v376_v43, %v998_v36 }
 0x4fc   :  { %v414_v61 = vadd.f32 %v383_v54, %v378_v52 }
 0x501   :  { %v411_v47 = vpop.permute.xlu0 %410 }
 0x502   :  { %v391_v46 = vpop.permute.xlu1 %390  ;;  %v413_v53 = vmul.f32 %v411_v47, %v1014_v42 }
 0x503   :  { %v393_v49 = vmul.f32 %v391_v46, %v995_v35 }
 0x504   :  { %v417_v62 = vadd.f32 %v413_v53, %v408_v58 }
 0x505   :  { %v415_v59 = vadd.f32 %v393_v49, %v388_v51 }
 0x507   :  { %v418_v1 = vadd.f32 %v415_v59, %v414_v61 }
 0x50b   :  { %v401_v55 = vpop.permute.xlu1 %400 }
 0x50c   :  { %v403_v60 = vmul.f32 %v401_v55, %v1001_v37 }
 0x50e   :  { %v416_v63 = vadd.f32 %v403_v60, %v398_v56 }
 0x510   :  { %v419_v6 = vadd.f32 %v417_v62, %v416_v63 }
 0x512   :  { %v420_v7 = vadd.f32 %v419_v6, %v418_v1 }
 0x514   :  { %422 = vrot.lane.b32.xlu2 %v420_v7, %s909_s28  ;;  %v131_v9 = vpop.permute.xlu1 %130 }
 0x515   :  { %v133_v10 = vmul.f32 %v956_v2, %v131_v9 }
 0x517   :  { %v134_v11 = vadd.f32 %v133_v10, %v964_v15 }
 0x56e   :  { %v423_v12 = vpop.permute.xlu2 %422 }
 0x56f   :  { %v425_v13 = vadd.f32 %v423_v12, %v134_v11  ;;  %v915_v11 = vmov 7  }
 0x571   :  { %797 = vtanh.f32 %v425_v13  ;;  %v916_v13 = vmov 24  }
 0x577   :  { %v798_v14 = vpop.eup %797 }
 0x578   :  { %v427_v16 = vsel %vm82_vm9, %v798_v14, %v371_v30  ;;  %v1120_v17 = vsel %vm82_vm9, %v798_v14, 0.0 }
 0x579   :  { %441 = vperm.xlu0 %759, %v427_v16   ;;  %436 = vperm.xlu2 %758, %v427_v16  }
 0x57a   :  { %431 = vperm.xlu1 %757, %v427_v16  }
 0x581   :  { %764 = vset.pattern.permute.xlu0 %v908_v27  ;;  %761 = vset.pattern.permute.xlu2 %v902_v5 }
 0x582   :  { %760 = vset.pattern.permute.xlu1 %v903_v22  ;;  %466 = vperm.xlu0 %764, %v427_v16  }
 0x583   :  { %451 = vperm.xlu2 %761, %v427_v16   ;;  %446 = vperm.xlu1 %760, %v427_v16  }
 0x58a   :  { %768 = vset.pattern.permute.xlu0 %v900_v3 }
 0x58b   :  { %763 = vset.pattern.permute.xlu2 %v905_v24  ;;  %762 = vset.pattern.permute.xlu1 %v906_v25 }
 0x58c   :  { %461 = vperm.xlu2 %763, %v427_v16   ;;  %456 = vperm.xlu1 %762, %v427_v16  }
 0x594   :  { %765 = vset.pattern.permute.xlu1 %v914_v18  ;;  %767 = vset.pattern.permute.xlu2 %v904_v23 }
 0x595   :  { %136 = vperm.xlu1 %765, %v953_v0  }
 0x59d   :  { %766 = vset.pattern.permute.xlu1 %v901_v4 }
 0x5d3   :  { %v437_v20 = vpop.permute.xlu2 %436 }
 0x5d4   :  { %v439_v47 = vmul.f32 %v437_v20, %v992_v34 }
 0x5dd   :  { %v452_v29 = vpop.permute.xlu2 %451 }
 0x5de   :  { %v454_v50 = vmul.f32 %v452_v29, %v1010_v40 }
 0x5e6   :  { %v462_v43 = vpop.permute.xlu2 %461 }
 0x5e7   :  { %v464_v51 = vmul.f32 %v462_v43, %v1007_v39 }
 0x5eb   :  { %v442_v28 = vpop.permute.xlu0 %441 }
 0x5ec   :  { %v432_v26 = vpop.permute.xlu1 %431  ;;  %v444_v44 = vmul.f32 %v442_v28, %v1004_v38 }
 0x5ed   :  { %v434_v45 = vmul.f32 %v432_v26, %v998_v36 }
 0x5ef   :  { %v470_v54 = vadd.f32 %v439_v47, %v434_v45 }
 0x5f4   :  { %v467_v32 = vpop.permute.xlu0 %466 }
 0x5f5   :  { %v447_v30 = vpop.permute.xlu1 %446  ;;  %v469_v46 = vmul.f32 %v467_v32, %v1014_v42 }
 0x5f6   :  { %v449_v41 = vmul.f32 %v447_v30, %v995_v35 }
 0x5f7   :  { %v473_v55 = vadd.f32 %v469_v46, %v464_v51 }
 0x5f8   :  { %v471_v52 = vadd.f32 %v449_v41, %v444_v44 }
 0x5fa   :  { %v474_v58 = vadd.f32 %v471_v52, %v470_v54 }
 0x5fe   :  { %v457_v49 = vpop.permute.xlu1 %456 }
 0x5ff   :  { %v459_v53 = vmul.f32 %v457_v49, %v1001_v37 }
 0x601   :  { %v472_v56 = vadd.f32 %v459_v53, %v454_v50 }
 0x603   :  { %v475_v59 = vadd.f32 %v473_v55, %v472_v56 }
 0x605   :  { %v476_v60 = vadd.f32 %v475_v59, %v474_v58 }
 0x607   :  { %478 = vrot.lane.b32.xlu2 %v476_v60, %s909_s28  ;;  %v137_v61 = vpop.permute.xlu1 %136 }
 0x608   :  { %v139_v62 = vmul.f32 %v956_v2, %v137_v61 }
 0x60a   :  { %v140_v63 = vadd.f32 %v139_v62, %v964_v15 }
 0x661   :  { %v479_v1 = vpop.permute.xlu2 %478 }
 0x662   :  { %v481_v6 = vadd.f32 %v479_v1, %v140_v63 }
 0x664   :  { %799 = vtanh.f32 %v481_v6 }
 0x66a   :  { %v800_v7 = vpop.eup %799 }
 0x66b   :  { %v483_v9 = vsel %vm83_vm10, %v800_v7, %v427_v16  ;;  %v1143_v10 = vsel %vm83_vm10, %v800_v7, 0.0 }
 0x66c   :  { %497 = vperm.xlu0 %768, %v483_v9   ;;  %492 = vperm.xlu2 %767, %v483_v9  }
 0x66d   :  { %487 = vperm.xlu1 %766, %v483_v9  }
 0x674   :  { %773 = vset.pattern.permute.xlu0 %v908_v27  ;;  %770 = vset.pattern.permute.xlu2 %v902_v5 }
 0x675   :  { %769 = vset.pattern.permute.xlu1 %v903_v22  ;;  %522 = vperm.xlu0 %773, %v483_v9  }
 0x676   :  { %507 = vperm.xlu2 %770, %v483_v9   ;;  %502 = vperm.xlu1 %769, %v483_v9  }
 0x67d   :  { %777 = vset.pattern.permute.xlu0 %v901_v4 }
 0x67e   :  { %772 = vset.pattern.permute.xlu2 %v905_v24  ;;  %771 = vset.pattern.permute.xlu1 %v906_v25 }
 0x67f   :  { %517 = vperm.xlu2 %772, %v483_v9   ;;  %512 = vperm.xlu1 %771, %v483_v9  }
 0x687   :  { %774 = vset.pattern.permute.xlu1 %v915_v11 }
 0x688   :  { %142 = vperm.xlu1 %774, %v953_v0  }
 0x690   :  { %775 = vset.pattern.permute.xlu1 %v916_v13 }
 0x691   :  { %543 = vperm.xlu1 %775, %v989_v33  }
 0x699   :  { %778 = vset.pattern.permute.xlu1 %v904_v23 }
 0x6c6   :  { %v493_v12 = vpop.permute.xlu2 %492 }
 0x6c7   :  { %v495_v32 = vmul.f32 %v493_v12, %v992_v34 }
 0x6d0   :  { %v508_v18 = vpop.permute.xlu2 %507 }
 0x6d1   :  { %v510_v43 = vmul.f32 %v508_v18, %v1010_v40 }
 0x6d9   :  { %v518_v28 = vpop.permute.xlu2 %517 }
 0x6da   :  { %v520_v44 = vmul.f32 %v518_v28, %v1007_v39 }
 0x6de   :  { %v498_v16 = vpop.permute.xlu0 %497 }
 0x6df   :  { %v488_v14 = vpop.permute.xlu1 %487  ;;  %v500_v29 = vmul.f32 %v498_v16, %v1004_v38 }
 0x6e0   :  { %v490_v30 = vmul.f32 %v488_v14, %v998_v36  ;;  %v917_v36 = vmov 25  }
 0x6e1   :  { %776 = vset.pattern.permute.xlu2 %v917_v36 }
 0x6e2   :  { %v526_v46 = vadd.f32 %v495_v32, %v490_v30 }
 0x6e7   :  { %v523_v20 = vpop.permute.xlu0 %522 }
 0x6e8   :  { %v503_v4 = vpop.permute.xlu1 %502  ;;  %v525_v0 = vmul.f32 %v523_v20, %v1014_v42 }
 0x6e9   :  { %v505_v26 = vmul.f32 %v503_v4, %v995_v35 }
 0x6ea   :  { %v529_v47 = vadd.f32 %v525_v0, %v520_v44 }
 0x6eb   :  { %v527_v45 = vadd.f32 %v505_v26, %v500_v29 }
 0x6ed   :  { %v530_v49 = vadd.f32 %v527_v45, %v526_v46 }
 0x6f1   :  { %v513_v41 = vpop.permute.xlu1 %512 }
 0x6f2   :  { %v515_v23 = vmul.f32 %v513_v41, %v1001_v37 }
 0x6f4   :  { %v528_v35 = vadd.f32 %v515_v23, %v510_v43 }
 0x6f6   :  { %v531_v50 = vadd.f32 %v529_v47, %v528_v35 }
 0x6f8   :  { %v532_v38 = vadd.f32 %v531_v50, %v530_v49 }
 0x6fa   :  { %534 = vrot.lane.b32.xlu2 %v532_v38, %s909_s28  ;;  %v143_v34 = vpop.permute.xlu1 %142 }
 0x6fb   :  { %v145_v39 = vmul.f32 %v956_v2, %v143_v34 }
 0x6fd   :  { %v146_v40 = vadd.f32 %v145_v39, %v964_v15 }
 0x702   :  { %548 = vperm.xlu2 %776, %v989_v33  }
 0x703   :  { %v544_v15 = vpop.permute.xlu1 %543 }
 0x70a   :  { %779 = vset.pattern.permute.xlu2 %v900_v3 }
 0x754   :  { %v535_v37 = vpop.permute.xlu2 %534 }
 0x755   :  { %v537_v42 = vadd.f32 %v535_v37, %v146_v40 }
 0x757   :  { %801 = vtanh.f32 %v537_v42 }
 0x75d   :  { %v802_v51 = vpop.eup %801 }
 0x75e   :  { %v539_v52 = vsel %vm84_vm11, %v802_v51, %v483_v9  ;;  %v540_v3 = vsel %vm84_vm11, %v802_v51, 0.0 }
 0x75f   :  { %566 = vperm.xlu2 %779, %v539_v52   ;;  %560 = vperm.xlu1 %778, %v539_v52  }
 0x760   :  { %554 = vperm.xlu0 %777, %v539_v52  }
 0x767   :  { %781 = vset.pattern.permute.xlu2 %v902_v5  ;;  %780 = vset.pattern.permute.xlu1 %v903_v22  ;;  %v549_v5 = vpop.permute.xlu2 %548 }
 0x768   :  { %782 = vset.pattern.permute.xlu0 %v906_v25  ;;  %578 = vperm.xlu2 %781, %v539_v52  }
 0x769   :  { %572 = vperm.xlu1 %780, %v539_v52   ;;  %584 = vperm.xlu0 %782, %v539_v52  }
 0x770   :  { %784 = vset.pattern.permute.xlu2 %v908_v27 }
 0x771   :  { %783 = vset.pattern.permute.xlu1 %v905_v24  ;;  %616 = vrot.lane.b32.xlu0 %v1074_v48, %s918_s29 }
 0x772   :  { %596 = vperm.xlu2 %784, %v539_v52   ;;  %590 = vperm.xlu1 %783, %v539_v52  }
 0x773   :  { %785 = vset.pattern.permute.xlu0 %v908_v27  ;;  %v546_v27 = vmul.f32 %v956_v2, %v544_v15 }
 0x775   :  { %v551_v33 = vadd.f32 %v549_v5, %v546_v27 }
 0x777   :  { %v569_v48 = vperm.slane %v551_v33, 2  ;;  %v581_v53 = vperm.slane %v551_v33, 4  ;;  %v599_v54 = vperm.slane %v551_v33, 7  ;;  %v557_v55 = vperm.slane %v551_v33, 0 }
 0x778   :  { %v563_v19 = vperm.slane %v551_v33, 1  ;;  %v587_v56 = vperm.slane %v551_v33, 5  ;;  %v593_v60 = vperm.slane %v551_v33, 6 }
 0x779   :  { %628 = vrot.lane.b32.xlu0 %v1143_v10, %s919_s30 }
 0x77a   :  { %612 = vrot.lane.b32.xlu2 %v1051_v57, %s909_s28  ;;  %608 = vrot.lane.b32.xlu1 %v970_v21, %s899_s0 }
 0x782   :  { %624 = vrot.lane.b32.xlu2 %v1120_v17, %s920_s4  ;;  %620 = vrot.lane.b32.xlu1 %v1097_v31, %s921_s5  ;;  %v575_v17 = vperm.slane %v551_v33, 3 }
 0x78a   :  { %632 = vrot.lane.b32.xlu1 %v540_v3, %s922_s6 }
 0x7b9   :  { %v567_v22 = vpop.permute.xlu2 %566 }
 0x7ba   :  { %v570_v61 = vmul.f32 %v569_v48, %v567_v22 }
 0x7c2   :  { %v579_v21 = vpop.permute.xlu2 %578 }
 0x7c3   :  { %v582_v2 = vmul.f32 %v581_v53, %v579_v21 }
 0x7cc   :  { %v597_v59 = vpop.permute.xlu2 %596 }
 0x7cd   :  { %v600_v7 = vmul.f32 %v599_v54, %v597_v59 }
 0x7d1   :  { %v561_v24 = vpop.permute.xlu1 %560 }
 0x7d2   :  { %v555_v25 = vpop.permute.xlu0 %554  ;;  %v564_v63 = vmul.f32 %v563_v19, %v561_v24 }
 0x7d3   :  { %v558_v62 = vmul.f32 %v557_v55, %v555_v25 }
 0x7d4   :  { %v613_v20 = vpop.permute.xlu2 %612 }
 0x7d5   :  { %v601_v11 = vadd.f32 %v564_v63, %v558_v62 }
 0x7db   :  { %v573_v57 = vpop.permute.xlu1 %572  ;;  %v585_v31 = vpop.permute.xlu0 %584 }
 0x7dc   :  { %v576_v58 = vmul.f32 %v575_v17, %v573_v57  ;;  %v588_v1 = vmul.f32 %v587_v56, %v585_v31  ;;  %v625_v0 = vpop.permute.xlu2 %624 }
 0x7de   :  { %v602_v9 = vadd.f32 %v576_v58, %v570_v61  ;;  %v603_v12 = vadd.f32 %v588_v1, %v582_v2 }
 0x7e0   :  { %v605_v14 = vadd.f32 %v602_v9, %v601_v11 }
 0x7e3   :  { %v617_v29 = vpop.permute.xlu0 %616 }
 0x7e4   :  { %v591_v6 = vpop.permute.xlu1 %590 }
 0x7e5   :  { %v594_v10 = vmul.f32 %v593_v60, %v591_v6 }
 0x7e7   :  { %v604_v13 = vadd.f32 %v600_v7, %v594_v10 }
 0x7e9   :  { %v606_v16 = vadd.f32 %v604_v13, %v603_v12 }
 0x7eb   :  { %v607_v18 = vadd.f32 %v606_v16, %v605_v14  ;;  %v629_v45 = vpop.permute.xlu0 %628 }
 0x7ec   :  { %v609_v4 = vpop.permute.xlu1 %608 }
 0x7ed   :  { %636 = vrot.lane.b32.xlu2 %v607_v18, %s920_s4  ;;  %v640_v26 = vsel %vm639_vm12, %v609_v4, %v1028_v8 }
 0x7ee   :  { %v642_v30 = vsel %vm641_vm13, %v640_v26, %v613_v20 }
 0x7ef   :  { %v644_v32 = vsel %vm643_vm14, %v642_v30, %v617_v29 }
 0x7f4   :  { %v621_v28 = vpop.permute.xlu1 %620 }
 0x7f5   :  { %v646_v41 = vsel %vm645_vm15, %v644_v32, %v621_v28 }
 0x7f6   :  { %v648_v43 = vsel %vm647_vm0, %v646_v41, %v625_v0 }
 0x7f7   :  { %v650_v23 = vsel %vm649_vm1, %v648_v43, %v629_v45 }
 0x7fc   :  { %v633_v44 = vpop.permute.xlu1 %632 }
 0x7fd   :  { %v652_v8 = vsel %vm651_vm2, %v650_v23, %v633_v44 }
 0x847   :  { %v637_v46 = vpop.permute.xlu2 %636 }
 0x848   :  { %v654_v47 = vsel %vm653_vm3, %v652_v8, %v637_v46 }
 0x849   :  { %v656_v35 = vsel %vm655_vm4, %v654_v47, 0.0 }
 0x84a   :  { %v658_v49 = vsel %vm657_vm5, %v656_v35, 0.0 }
 0x84b   :  { %659 = vst [vmem:[#allocation9] sm:$0xff] %v658_v49 }
 0x84c   :  { %670 = dma.vmem_to_hbm [thread:$0]  %s666_s8, 128, %s668_s11, [#allocation4]  }
 0x84d   :  { %893 = dma.done.wait [#allocation4], 128  }
 0x84e   :  { %894 = vsyncadd [#allocation4], 4294967168 }
 0x84f   :  { %675 = vsyncpa [#allocation3], 1 }
 0x850   :  { %676 = vsyncpa [#allocation8], 1 }
 0x851   :  { %677 = vsyncpa [#allocation4], 1 }
 0x852   :  { %678 = vsyncpa [#allocation5], 1 }

</bundles_post_ra>
